<compile_context>
chip_gen: v7x
topology: tpu7x:2x2x1
jax: 0.10.0
libtpu: 0.0.40
codegen_flags: <defaults>
</compile_context>

<pallas_src>
import functools
from typing import NamedTuple

import jax
import jax.numpy as jnp
from jax.experimental import pallas as pl
from jax.experimental.pallas import tpu as pltpu

D_MODEL = 32
N_HEADS = 4
D_HEAD = D_MODEL // N_HEADS
D_FF = 64
LN_EPS = 1e-5          # nn.LayerNorm default
NEG_INF = -1e9


class SingleForwardState(NamedTuple):
    sequences: jnp.ndarray
    mask: jnp.ndarray


# ----------------------------------------------------------------------------
# In-kernel helpers (trace-time composition; everything lives in vregs)
# ----------------------------------------------------------------------------
def _layer_norm(x, gamma, beta):
    mean = jnp.mean(x, axis=-1, keepdims=True)
    xc = x - mean
    var = jnp.mean(xc * xc, axis=-1, keepdims=True)
    inv = jax.lax.rsqrt(var + LN_EPS)
    return xc * inv * gamma + beta


def _softmax_rows(s):
    m = jnp.max(s, axis=-1, keepdims=True)
    p = jnp.exp(s - m)
    denom = jnp.sum(p, axis=-1, keepdims=True)
    return p * pl.reciprocal(denom, approx=True)


def _mha(x_q, x_kv, mask_ref, wqkv, bqkv, wo, bo, *, B, Tq, Tk):
    """Multi-head attention fully in-kernel (no VMEM scratch).

    x_q: [B*Tq, D], x_kv: [B*Tk, D], mask_ref: Ref[B, Tq, Tk] (additive bias).
    wqkv: [D, 3D] with W_Q pre-scaled by 1/sqrt(d_head); bqkv: [1, 3D].
    Returns [B*Tq, D] = concat_heads(attn) @ W_O + b_O, computed as a per-head
    accumulation so the merged-head tensor never needs to be materialized.
    """
    if x_q is x_kv:
        # Self-attention: one fused QKV matmul.
        qkv = jnp.dot(x_q, wqkv, preferred_element_type=jnp.float32) + bqkv
        q = qkv[:, :D_MODEL]
        k = qkv[:, D_MODEL:2 * D_MODEL]
        v = qkv[:, 2 * D_MODEL:]
    else:
        # Cross-attention: Q from the target stream, K|V from memory.
        q = jnp.dot(x_q, wqkv[:, :D_MODEL],
                    preferred_element_type=jnp.float32) + bqkv[:, :D_MODEL]
        kv = jnp.dot(x_kv, wqkv[:, D_MODEL:],
                     preferred_element_type=jnp.float32) + bqkv[:, D_MODEL:]
        k = kv[:, :D_MODEL]
        v = kv[:, D_MODEL:]

    outs = []
    for b in range(B):
        bias = mask_ref[b]                               # [Tq, Tk], shared by heads
        q_b = q[b * Tq:(b + 1) * Tq, :]
        k_b = k[b * Tk:(b + 1) * Tk, :]
        v_b = v[b * Tk:(b + 1) * Tk, :]
        acc = None
        for h in range(N_HEADS):
            lo, hi = h * D_HEAD, (h + 1) * D_HEAD
            # q @ k^T via dot_general (contract last dims), no explicit transpose.
            s = jax.lax.dot_general(
                q_b[:, lo:hi], k_b[:, lo:hi], (((1,), (1,)), ((), ())),
                preferred_element_type=jnp.float32) + bias
            p = _softmax_rows(s)
            o_h = jnp.dot(p, v_b[:, lo:hi], preferred_element_type=jnp.float32)
            # Fold head-merge + output projection: concat(heads) @ W_O
            #   == sum_h o_h @ W_O[h*Dh:(h+1)*Dh, :]
            c = jnp.dot(o_h, wo[lo:hi, :], preferred_element_type=jnp.float32)
            acc = c if acc is None else acc + c
        outs.append(acc)
    merged = outs[0] if B == 1 else jnp.concatenate(outs, axis=0)   # [B*Tq, D]
    return merged + bo


# ----------------------------------------------------------------------------
# One fused kernel for the whole decoder layer
# ----------------------------------------------------------------------------
def _decoder_layer_kernel(
    x_ref, mem_ref, tmask_ref, smask_ref,
    t_wqkv_ref, t_wo_ref, s_wqkv_ref, s_wo_ref,
    ff_w1_ref, ff_w2_ref, bias_ref, ln_ref,
    out_ref,
    *, B, T, S,
):
    x = x_ref[...].astype(jnp.float32)            # [B*T, D]
    mem = mem_ref[...].astype(jnp.float32)        # [B*S, D]
    biases = bias_ref[...]                        # [6, 3D] packed bias rows
    ln = ln_ref[...]                              # [6, D]  packed LN params

    t_bqkv = biases[0:1, :]                       # [1, 3D] (b_q pre-scaled)
    s_bqkv = biases[1:2, :]
    t_bo = biases[2:3, :D_MODEL]
    s_bo = biases[3:4, :D_MODEL]
    ff_b1 = biases[4:5, :D_FF]
    ff_b2 = biases[5:6, :D_MODEL]

    # --- Sublayer 1: target self-attention  (x + MHA(LN(x)))
    # TODO(synk): dropout (p=0.3) implemented as eval-mode identity (deterministic).
    y = _layer_norm(x, ln[0:1, :], ln[1:2, :])
    x = x + _mha(y, y, tmask_ref, t_wqkv_ref[...], t_bqkv,
                 t_wo_ref[...], t_bo, B=B, Tq=T, Tk=T)

    # --- Sublayer 2: source cross-attention  (x + MHA(LN(x), memory))
    y = _layer_norm(x, ln[2:3, :], ln[3:4, :])
    x = x + _mha(y, mem, smask_ref, s_wqkv_ref[...], s_bqkv,
                 s_wo_ref[...], s_bo, B=B, Tq=T, Tk=S)

    # --- Sublayer 3: feed-forward  (x + W2 @ relu(W1 @ LN(x)))
    y = _layer_norm(x, ln[4:5, :], ln[5:6, :])
    h = jnp.maximum(
        jnp.dot(y, ff_w1_ref[...], preferred_element_type=jnp.float32) + ff_b1,
        0.0)
    x = x + jnp.dot(h, ff_w2_ref[...], preferred_element_type=jnp.float32) + ff_b2

    out_ref[...] = x.astype(out_ref.dtype)


def _vmem_spec(shape):
    zeros = (0,) * len(shape)
    return pl.BlockSpec(shape, lambda i, z=zeros: z)


def _fuse_qkv(p, scale):
    # Fold the 1/sqrt(d_head) attention scale into W_Q / b_Q (cold path).
    wqkv = jnp.concatenate([p["wq"] * scale, p["wk"], p["wv"]], axis=1)   # [D, 3D]
    bqkv = jnp.concatenate([p["bq"] * scale, p["bk"], p["bv"]], axis=0)   # [3D]
    return wqkv, bqkv


def decoder_layer_forward(params, x_state, memory_state):
    tgt_mask = x_state.mask
    x = x_state.sequences
    src_mask = memory_state.mask
    memory = memory_state.sequences

    B, T, D = x.shape
    S = memory.shape[1]
    assert D == D_MODEL

    # Weight prep (cold path, tiny): fuse Q/K/V, fold scale, pack small vectors.
    scale = 1.0 / (D_HEAD ** 0.5)
    t_wqkv, t_bqkv = _fuse_qkv(params["tgt_attn"], scale)
    s_wqkv, s_bqkv = _fuse_qkv(params["src_attn"], scale)
    ff = params["ff"]

    def pad_row(v):
        return jnp.pad(v, (0, 3 * D_MODEL - v.shape[0]))

    bias_pack = jnp.stack([
        t_bqkv,
        s_bqkv,
        pad_row(params["tgt_attn"]["bo"]),
        pad_row(params["src_attn"]["bo"]),
        pad_row(ff["b1"]),
        pad_row(ff["b2"]),
    ], axis=0).astype(jnp.float32)                               # [6, 3D]

    ln_pack = jnp.stack([
        params["ln_attn"]["gamma"], params["ln_attn"]["beta"],
        params["ln_src_attn"]["gamma"], params["ln_src_attn"]["beta"],
        params["ln_ff"]["gamma"], params["ln_ff"]["beta"],
    ], axis=0).astype(jnp.float32)                               # [6, D]

    inputs = [
        x.reshape(B * T, D),
        memory.reshape(B * S, D),
        tgt_mask.astype(jnp.float32),
        src_mask.astype(jnp.float32),
        t_wqkv, params["tgt_attn"]["wo"],
        s_wqkv, params["src_attn"]["wo"],
        ff["w1"], ff["w2"],
        bias_pack, ln_pack,
    ]

    out2d = pl.pallas_call(
        functools.partial(_decoder_layer_kernel, B=B, T=T, S=S),
        out_shape=jax.ShapeDtypeStruct((B * T, D), x.dtype),
        grid=(1,),
        in_specs=[_vmem_spec(a.shape) for a in inputs],
        out_specs=_vmem_spec((B * T, D)),
        compiler_params=pltpu.CompilerParams(
            dimension_semantics=("arbitrary",)),
    )(*inputs)

    return SingleForwardState(sequences=out2d.reshape(B, T, D), mask=tgt_mask)


# ----------------------------------------------------------------------------
# Deterministic parameter init
# ----------------------------------------------------------------------------
def _init_attn_params(key):
    ks = jax.random.split(key, 4)
    scale = 0.02
    return dict(
        wq=scale * jax.random.normal(ks[0], (D_MODEL, D_MODEL), jnp.float32),
        bq=jnp.zeros((D_MODEL,), jnp.float32),
        wk=scale * jax.random.normal(ks[1], (D_MODEL, D_MODEL), jnp.float32),
        bk=jnp.zeros((D_MODEL,), jnp.float32),
        wv=scale * jax.random.normal(ks[2], (D_MODEL, D_MODEL), jnp.float32),
        bv=jnp.zeros((D_MODEL,), jnp.float32),
        wo=scale * jax.random.normal(ks[3], (D_MODEL, D_MODEL), jnp.float32),
        bo=jnp.zeros((D_MODEL,), jnp.float32),
    )


def _init_ln_params():
    return dict(gamma=jnp.ones((D_MODEL,), jnp.float32),
                beta=jnp.zeros((D_MODEL,), jnp.float32))


def init_decoder_params(key):
    k_tgt, k_src, k_ff1, k_ff2 = jax.random.split(key, 4)
    scale = 0.02
    return dict(
        tgt_attn=_init_attn_params(k_tgt),
        src_attn=_init_attn_params(k_src),
        ff=dict(
            w1=scale * jax.random.normal(k_ff1, (D_MODEL, D_FF), jnp.float32),
            b1=jnp.zeros((D_FF,), jnp.float32),
            w2=scale * jax.random.normal(k_ff2, (D_FF, D_MODEL), jnp.float32),
            b2=jnp.zeros((D_MODEL,), jnp.float32),
        ),
        ln_attn=_init_ln_params(),
        ln_src_attn=_init_ln_params(),
        ln_ff=_init_ln_params(),
    )


if __name__ == "__main__":
    B, T, S = 2, 8, 8  # batch, target seq, source (memory) seq

    root = jax.random.PRNGKey(0)
    k_params, k_x, k_mem = jax.random.split(root, 3)
    params = init_decoder_params(k_params)

    x = jax.random.normal(k_x, (B, T, D_MODEL), jnp.float32)
    memory = jax.random.normal(k_mem, (B, S, D_MODEL), jnp.float32)

    # Causal target mask (additive bias), full-visibility source mask.
    causal = jnp.tril(jnp.ones((T, T), jnp.bool_))
    tgt_mask = jnp.where(causal, 0.0, NEG_INF).astype(jnp.float32)
    tgt_mask = jnp.broadcast_to(tgt_mask[None], (B, T, T))
    src_mask = jnp.zeros((B, T, S), jnp.float32)

    x_state = SingleForwardState(sequences=x, mask=tgt_mask)
    mem_state = SingleForwardState(sequences=memory, mask=src_mask)

    out_state = decoder_layer_forward(params, x_state, mem_state)
    jax.block_until_ready(out_state.sequences)

    assert out_state.sequences.shape == (B, T, D_MODEL)
    assert out_state.mask.shape == (B, T, T)
    assert bool(jnp.all(jnp.isfinite(out_state.sequences)))
    print("KERNEL_OK")
</pallas_src>

<mosaic_0001>
module attributes {stable_mosaic.version = 11 : i64} {
  func.func @_decoder_layer_kernel(%arg0: i32, %arg1: memref<16x32xf32, #tpu.memory_space<vmem>>, %arg2: memref<16x32xf32, #tpu.memory_space<vmem>>, %arg3: memref<2x8x8xf32, #tpu.memory_space<vmem>>, %arg4: memref<2x8x8xf32, #tpu.memory_space<vmem>>, %arg5: memref<32x96xf32, #tpu.memory_space<vmem>>, %arg6: memref<32x32xf32, #tpu.memory_space<vmem>>, %arg7: memref<32x96xf32, #tpu.memory_space<vmem>>, %arg8: memref<32x32xf32, #tpu.memory_space<vmem>>, %arg9: memref<32x64xf32, #tpu.memory_space<vmem>>, %arg10: memref<64x32xf32, #tpu.memory_space<vmem>>, %arg11: memref<6x96xf32, #tpu.memory_space<vmem>>, %arg12: memref<6x32xf32, #tpu.memory_space<vmem>>, %arg13: memref<16x32xf32, #tpu.memory_space<vmem>>) attributes {dimension_semantics = [#tpu.dimension_semantics<arbitrary>], iteration_bounds = array<i64: 1>, scalar_prefetch = 0 : i64, scratch_operands = 0 : i64, tpu.core_type = #tpu.core_type<tc>, window_params = [{pipeline_mode = #tpu.pipeline_mode<synchronous>, transform_indices = @transform_0, window_bounds = array<i64: 16, 32>}, {pipeline_mode = #tpu.pipeline_mode<synchronous>, transform_indices = @transform_1, window_bounds = array<i64: 16, 32>}, {pipeline_mode = #tpu.pipeline_mode<synchronous>, transform_indices = @transform_2, window_bounds = array<i64: 2, 8, 8>}, {pipeline_mode = #tpu.pipeline_mode<synchronous>, transform_indices = @transform_3, window_bounds = array<i64: 2, 8, 8>}, {pipeline_mode = #tpu.pipeline_mode<synchronous>, transform_indices = @transform_4, window_bounds = array<i64: 32, 96>}, {pipeline_mode = #tpu.pipeline_mode<synchronous>, transform_indices = @transform_5, window_bounds = array<i64: 32, 32>}, {pipeline_mode = #tpu.pipeline_mode<synchronous>, transform_indices = @transform_6, window_bounds = array<i64: 32, 96>}, {pipeline_mode = #tpu.pipeline_mode<synchronous>, transform_indices = @transform_7, window_bounds = array<i64: 32, 32>}, {pipeline_mode = #tpu.pipeline_mode<synchronous>, transform_indices = @transform_8, window_bounds = array<i64: 32, 64>}, {pipeline_mode = #tpu.pipeline_mode<synchronous>, transform_indices = @transform_9, window_bounds = array<i64: 64, 32>}, {pipeline_mode = #tpu.pipeline_mode<synchronous>, transform_indices = @transform_10, window_bounds = array<i64: 6, 96>}, {pipeline_mode = #tpu.pipeline_mode<synchronous>, transform_indices = @transform_11, window_bounds = array<i64: 6, 32>}, {pipeline_mode = #tpu.pipeline_mode<synchronous>, transform_indices = @transform_12, window_bounds = array<i64: 16, 32>}]} {
    %c0 = arith.constant 0 : index
    %c0_0 = arith.constant 0 : index
    %0 = vector.load %arg1[%c0, %c0_0] : memref<16x32xf32, #tpu.memory_space<vmem>>, vector<16x32xf32>
    %c0_1 = arith.constant 0 : index
    %c0_2 = arith.constant 0 : index
    %1 = vector.load %arg2[%c0_1, %c0_2] : memref<16x32xf32, #tpu.memory_space<vmem>>, vector<16x32xf32>
    %c0_3 = arith.constant 0 : index
    %c0_4 = arith.constant 0 : index
    %2 = vector.load %arg11[%c0_3, %c0_4] : memref<6x96xf32, #tpu.memory_space<vmem>>, vector<6x96xf32>
    %c0_5 = arith.constant 0 : index
    %c0_6 = arith.constant 0 : index
    %3 = vector.load %arg12[%c0_5, %c0_6] : memref<6x32xf32, #tpu.memory_space<vmem>>, vector<6x32xf32>
    %4 = vector.extract_strided_slice %2 {offsets = [0, 0], sizes = [1, 96], strides = [1, 1]} : vector<6x96xf32> to vector<1x96xf32>
    %5 = vector.extract_strided_slice %2 {offsets = [1, 0], sizes = [1, 96], strides = [1, 1]} : vector<6x96xf32> to vector<1x96xf32>
    %6 = vector.extract_strided_slice %2 {offsets = [2, 0], sizes = [1, 32], strides = [1, 1]} : vector<6x96xf32> to vector<1x32xf32>
    %7 = vector.extract_strided_slice %2 {offsets = [3, 0], sizes = [1, 32], strides = [1, 1]} : vector<6x96xf32> to vector<1x32xf32>
    %8 = vector.extract_strided_slice %2 {offsets = [4, 0], sizes = [1, 64], strides = [1, 1]} : vector<6x96xf32> to vector<1x64xf32>
    %9 = vector.extract_strided_slice %2 {offsets = [5, 0], sizes = [1, 32], strides = [1, 1]} : vector<6x96xf32> to vector<1x32xf32>
    %10 = vector.extract_strided_slice %3 {offsets = [0, 0], sizes = [1, 32], strides = [1, 1]} : vector<6x32xf32> to vector<1x32xf32>
    %11 = vector.extract_strided_slice %3 {offsets = [1, 0], sizes = [1, 32], strides = [1, 1]} : vector<6x32xf32> to vector<1x32xf32>
    %cst = arith.constant dense<0.000000e+00> : vector<16xf32>
    %12 = vector.multi_reduction <add>, %0, %cst [1] : vector<16x32xf32> to vector<16xf32>
    %13 = vector.shape_cast %12 : vector<16xf32> to vector<16x1xf32>
    %cst_7 = arith.constant 3.200000e+01 : f32
    %14 = vector.broadcast %cst_7 : f32 to vector<16x1xf32>
    %15 = arith.divf %13, %14 : vector<16x1xf32>
    %16 = vector.broadcast %15 : vector<16x1xf32> to vector<16x32xf32>
    %17 = arith.subf %0, %16 : vector<16x32xf32>
    %18 = arith.mulf %17, %17 : vector<16x32xf32>
    %cst_8 = arith.constant dense<0.000000e+00> : vector<16xf32>
    %19 = vector.multi_reduction <add>, %18, %cst_8 [1] : vector<16x32xf32> to vector<16xf32>
    %20 = vector.shape_cast %19 : vector<16xf32> to vector<16x1xf32>
    %cst_9 = arith.constant 3.200000e+01 : f32
    %21 = vector.broadcast %cst_9 : f32 to vector<16x1xf32>
    %22 = arith.divf %20, %21 : vector<16x1xf32>
    %cst_10 = arith.constant 9.99999974E-6 : f32
    %23 = vector.broadcast %cst_10 : f32 to vector<16x1xf32>
    %24 = arith.addf %22, %23 : vector<16x1xf32>
    %25 = math.rsqrt %24 : vector<16x1xf32>
    %26 = vector.broadcast %25 : vector<16x1xf32> to vector<16x32xf32>
    %27 = arith.mulf %17, %26 : vector<16x32xf32>
    %28 = vector.broadcast %10 : vector<1x32xf32> to vector<16x32xf32>
    %29 = arith.mulf %27, %28 : vector<16x32xf32>
    %30 = vector.broadcast %11 : vector<1x32xf32> to vector<16x32xf32>
    %31 = arith.addf %29, %30 : vector<16x32xf32>
    %c0_11 = arith.constant 0 : index
    %c0_12 = arith.constant 0 : index
    %32 = vector.load %arg5[%c0_11, %c0_12] : memref<32x96xf32, #tpu.memory_space<vmem>>, vector<32x96xf32>
    %c0_13 = arith.constant 0 : index
    %c0_14 = arith.constant 0 : index
    %33 = vector.load %arg6[%c0_13, %c0_14] : memref<32x32xf32, #tpu.memory_space<vmem>>, vector<32x32xf32>
    %cst_15 = arith.constant dense<0.000000e+00> : vector<16x96xf32>
    %34 = tpu.matmul %31, %32, %cst_15 {dimension_numbers = #tpu.dot_dimension_numbers<[1], [0], [0], [1], [0, 0, 1, 1], [], []>} : vector<16x32xf32>, vector<32x96xf32>, vector<16x96xf32> -> vector<16x96xf32>
    %35 = vector.broadcast %4 : vector<1x96xf32> to vector<16x96xf32>
    %36 = arith.addf %34, %35 : vector<16x96xf32>
    %37 = vector.extract_strided_slice %36 {offsets = [0, 0], sizes = [16, 32], strides = [1, 1]} : vector<16x96xf32> to vector<16x32xf32>
    %38 = vector.extract_strided_slice %36 {offsets = [0, 32], sizes = [16, 32], strides = [1, 1]} : vector<16x96xf32> to vector<16x32xf32>
    %39 = vector.extract_strided_slice %36 {offsets = [0, 64], sizes = [16, 32], strides = [1, 1]} : vector<16x96xf32> to vector<16x32xf32>
    %c0_16 = arith.constant 0 : index
    %c0_17 = arith.constant 0 : index
    %c0_18 = arith.constant 0 : index
    %40 = vector.load %arg3[%c0_16, %c0_17, %c0_18] : memref<2x8x8xf32, #tpu.memory_space<vmem>>, vector<1x8x8xf32>
    %41 = vector.shape_cast %40 : vector<1x8x8xf32> to vector<8x8xf32>
    %42 = vector.extract_strided_slice %37 {offsets = [0, 0], sizes = [8, 32], strides = [1, 1]} : vector<16x32xf32> to vector<8x32xf32>
    %43 = vector.extract_strided_slice %38 {offsets = [0, 0], sizes = [8, 32], strides = [1, 1]} : vector<16x32xf32> to vector<8x32xf32>
    %44 = vector.extract_strided_slice %39 {offsets = [0, 0], sizes = [8, 32], strides = [1, 1]} : vector<16x32xf32> to vector<8x32xf32>
    %45 = vector.extract_strided_slice %42 {offsets = [0, 0], sizes = [8, 8], strides = [1, 1]} : vector<8x32xf32> to vector<8x8xf32>
    %46 = vector.extract_strided_slice %43 {offsets = [0, 0], sizes = [8, 8], strides = [1, 1]} : vector<8x32xf32> to vector<8x8xf32>
    %cst_19 = arith.constant dense<0.000000e+00> : vector<8x8xf32>
    %47 = tpu.matmul %45, %46, %cst_19 {dimension_numbers = #tpu.dot_dimension_numbers<[1], [1], [0], [0], [0, 0, 1, 0], [], []>} : vector<8x8xf32>, vector<8x8xf32>, vector<8x8xf32> -> vector<8x8xf32>
    %48 = arith.addf %47, %41 : vector<8x8xf32>
    %cst_20 = arith.constant dense<0xFF800000> : vector<8xf32>
    %49 = vector.multi_reduction <maximumf>, %48, %cst_20 [1] : vector<8x8xf32> to vector<8xf32>
    %50 = vector.shape_cast %49 : vector<8xf32> to vector<8x1xf32>
    %51 = vector.broadcast %50 : vector<8x1xf32> to vector<8x8xf32>
    %52 = arith.subf %48, %51 : vector<8x8xf32>
    %53 = math.exp %52 : vector<8x8xf32>
    %cst_21 = arith.constant dense<0.000000e+00> : vector<8xf32>
    %54 = vector.multi_reduction <add>, %53, %cst_21 [1] : vector<8x8xf32> to vector<8xf32>
    %55 = vector.shape_cast %54 : vector<8xf32> to vector<8x1xf32>
    %56 = tpu.reciprocal %55 {approx = true} : vector<8x1xf32> -> vector<8x1xf32>
    %57 = vector.broadcast %56 : vector<8x1xf32> to vector<8x8xf32>
    %58 = arith.mulf %53, %57 : vector<8x8xf32>
    %59 = vector.extract_strided_slice %44 {offsets = [0, 0], sizes = [8, 8], strides = [1, 1]} : vector<8x32xf32> to vector<8x8xf32>
    %cst_22 = arith.constant dense<0.000000e+00> : vector<8x8xf32>
    %60 = tpu.matmul %58, %59, %cst_22 {dimension_numbers = #tpu.dot_dimension_numbers<[1], [0], [0], [1], [0, 0, 1, 1], [], []>} : vector<8x8xf32>, vector<8x8xf32>, vector<8x8xf32> -> vector<8x8xf32>
    %61 = vector.extract_strided_slice %33 {offsets = [0, 0], sizes = [8, 32], strides = [1, 1]} : vector<32x32xf32> to vector<8x32xf32>
    %cst_23 = arith.constant dense<0.000000e+00> : vector<8x32xf32>
    %62 = tpu.matmul %60, %61, %cst_23 {dimension_numbers = #tpu.dot_dimension_numbers<[1], [0], [0], [1], [0, 0, 1, 1], [], []>} : vector<8x8xf32>, vector<8x32xf32>, vector<8x32xf32> -> vector<8x32xf32>
    %63 = vector.extract_strided_slice %42 {offsets = [0, 8], sizes = [8, 8], strides = [1, 1]} : vector<8x32xf32> to vector<8x8xf32>
    %64 = vector.extract_strided_slice %43 {offsets = [0, 8], sizes = [8, 8], strides = [1, 1]} : vector<8x32xf32> to vector<8x8xf32>
    %cst_24 = arith.constant dense<0.000000e+00> : vector<8x8xf32>
    %65 = tpu.matmul %63, %64, %cst_24 {dimension_numbers = #tpu.dot_dimension_numbers<[1], [1], [0], [0], [0, 0, 1, 0], [], []>} : vector<8x8xf32>, vector<8x8xf32>, vector<8x8xf32> -> vector<8x8xf32>
    %66 = arith.addf %65, %41 : vector<8x8xf32>
    %cst_25 = arith.constant dense<0xFF800000> : vector<8xf32>
    %67 = vector.multi_reduction <maximumf>, %66, %cst_25 [1] : vector<8x8xf32> to vector<8xf32>
    %68 = vector.shape_cast %67 : vector<8xf32> to vector<8x1xf32>
    %69 = vector.broadcast %68 : vector<8x1xf32> to vector<8x8xf32>
    %70 = arith.subf %66, %69 : vector<8x8xf32>
    %71 = math.exp %70 : vector<8x8xf32>
    %cst_26 = arith.constant dense<0.000000e+00> : vector<8xf32>
    %72 = vector.multi_reduction <add>, %71, %cst_26 [1] : vector<8x8xf32> to vector<8xf32>
    %73 = vector.shape_cast %72 : vector<8xf32> to vector<8x1xf32>
    %74 = tpu.reciprocal %73 {approx = true} : vector<8x1xf32> -> vector<8x1xf32>
    %75 = vector.broadcast %74 : vector<8x1xf32> to vector<8x8xf32>
    %76 = arith.mulf %71, %75 : vector<8x8xf32>
    %77 = vector.extract_strided_slice %44 {offsets = [0, 8], sizes = [8, 8], strides = [1, 1]} : vector<8x32xf32> to vector<8x8xf32>
    %cst_27 = arith.constant dense<0.000000e+00> : vector<8x8xf32>
    %78 = tpu.matmul %76, %77, %cst_27 {dimension_numbers = #tpu.dot_dimension_numbers<[1], [0], [0], [1], [0, 0, 1, 1], [], []>} : vector<8x8xf32>, vector<8x8xf32>, vector<8x8xf32> -> vector<8x8xf32>
    %79 = vector.extract_strided_slice %33 {offsets = [8, 0], sizes = [8, 32], strides = [1, 1]} : vector<32x32xf32> to vector<8x32xf32>
    %cst_28 = arith.constant dense<0.000000e+00> : vector<8x32xf32>
    %80 = tpu.matmul %78, %79, %cst_28 {dimension_numbers = #tpu.dot_dimension_numbers<[1], [0], [0], [1], [0, 0, 1, 1], [], []>} : vector<8x8xf32>, vector<8x32xf32>, vector<8x32xf32> -> vector<8x32xf32>
    %81 = arith.addf %62, %80 : vector<8x32xf32>
    %82 = vector.extract_strided_slice %42 {offsets = [0, 16], sizes = [8, 8], strides = [1, 1]} : vector<8x32xf32> to vector<8x8xf32>
    %83 = vector.extract_strided_slice %43 {offsets = [0, 16], sizes = [8, 8], strides = [1, 1]} : vector<8x32xf32> to vector<8x8xf32>
    %cst_29 = arith.constant dense<0.000000e+00> : vector<8x8xf32>
    %84 = tpu.matmul %82, %83, %cst_29 {dimension_numbers = #tpu.dot_dimension_numbers<[1], [1], [0], [0], [0, 0, 1, 0], [], []>} : vector<8x8xf32>, vector<8x8xf32>, vector<8x8xf32> -> vector<8x8xf32>
    %85 = arith.addf %84, %41 : vector<8x8xf32>
    %cst_30 = arith.constant dense<0xFF800000> : vector<8xf32>
    %86 = vector.multi_reduction <maximumf>, %85, %cst_30 [1] : vector<8x8xf32> to vector<8xf32>
    %87 = vector.shape_cast %86 : vector<8xf32> to vector<8x1xf32>
    %88 = vector.broadcast %87 : vector<8x1xf32> to vector<8x8xf32>
    %89 = arith.subf %85, %88 : vector<8x8xf32>
    %90 = math.exp %89 : vector<8x8xf32>
    %cst_31 = arith.constant dense<0.000000e+00> : vector<8xf32>
    %91 = vector.multi_reduction <add>, %90, %cst_31 [1] : vector<8x8xf32> to vector<8xf32>
    %92 = vector.shape_cast %91 : vector<8xf32> to vector<8x1xf32>
    %93 = tpu.reciprocal %92 {approx = true} : vector<8x1xf32> -> vector<8x1xf32>
    %94 = vector.broadcast %93 : vector<8x1xf32> to vector<8x8xf32>
    %95 = arith.mulf %90, %94 : vector<8x8xf32>
    %96 = vector.extract_strided_slice %44 {offsets = [0, 16], sizes = [8, 8], strides = [1, 1]} : vector<8x32xf32> to vector<8x8xf32>
    %cst_32 = arith.constant dense<0.000000e+00> : vector<8x8xf32>
    %97 = tpu.matmul %95, %96, %cst_32 {dimension_numbers = #tpu.dot_dimension_numbers<[1], [0], [0], [1], [0, 0, 1, 1], [], []>} : vector<8x8xf32>, vector<8x8xf32>, vector<8x8xf32> -> vector<8x8xf32>
    %98 = vector.extract_strided_slice %33 {offsets = [16, 0], sizes = [8, 32], strides = [1, 1]} : vector<32x32xf32> to vector<8x32xf32>
    %cst_33 = arith.constant dense<0.000000e+00> : vector<8x32xf32>
    %99 = tpu.matmul %97, %98, %cst_33 {dimension_numbers = #tpu.dot_dimension_numbers<[1], [0], [0], [1], [0, 0, 1, 1], [], []>} : vector<8x8xf32>, vector<8x32xf32>, vector<8x32xf32> -> vector<8x32xf32>
    %100 = arith.addf %81, %99 : vector<8x32xf32>
    %101 = vector.extract_strided_slice %42 {offsets = [0, 24], sizes = [8, 8], strides = [1, 1]} : vector<8x32xf32> to vector<8x8xf32>
    %102 = vector.extract_strided_slice %43 {offsets = [0, 24], sizes = [8, 8], strides = [1, 1]} : vector<8x32xf32> to vector<8x8xf32>
    %cst_34 = arith.constant dense<0.000000e+00> : vector<8x8xf32>
    %103 = tpu.matmul %101, %102, %cst_34 {dimension_numbers = #tpu.dot_dimension_numbers<[1], [1], [0], [0], [0, 0, 1, 0], [], []>} : vector<8x8xf32>, vector<8x8xf32>, vector<8x8xf32> -> vector<8x8xf32>
    %104 = arith.addf %103, %41 : vector<8x8xf32>
    %cst_35 = arith.constant dense<0xFF800000> : vector<8xf32>
    %105 = vector.multi_reduction <maximumf>, %104, %cst_35 [1] : vector<8x8xf32> to vector<8xf32>
    %106 = vector.shape_cast %105 : vector<8xf32> to vector<8x1xf32>
    %107 = vector.broadcast %106 : vector<8x1xf32> to vector<8x8xf32>
    %108 = arith.subf %104, %107 : vector<8x8xf32>
    %109 = math.exp %108 : vector<8x8xf32>
    %cst_36 = arith.constant dense<0.000000e+00> : vector<8xf32>
    %110 = vector.multi_reduction <add>, %109, %cst_36 [1] : vector<8x8xf32> to vector<8xf32>
    %111 = vector.shape_cast %110 : vector<8xf32> to vector<8x1xf32>
    %112 = tpu.reciprocal %111 {approx = true} : vector<8x1xf32> -> vector<8x1xf32>
    %113 = vector.broadcast %112 : vector<8x1xf32> to vector<8x8xf32>
    %114 = arith.mulf %109, %113 : vector<8x8xf32>
    %115 = vector.extract_strided_slice %44 {offsets = [0, 24], sizes = [8, 8], strides = [1, 1]} : vector<8x32xf32> to vector<8x8xf32>
    %cst_37 = arith.constant dense<0.000000e+00> : vector<8x8xf32>
    %116 = tpu.matmul %114, %115, %cst_37 {dimension_numbers = #tpu.dot_dimension_numbers<[1], [0], [0], [1], [0, 0, 1, 1], [], []>} : vector<8x8xf32>, vector<8x8xf32>, vector<8x8xf32> -> vector<8x8xf32>
    %117 = vector.extract_strided_slice %33 {offsets = [24, 0], sizes = [8, 32], strides = [1, 1]} : vector<32x32xf32> to vector<8x32xf32>
    %cst_38 = arith.constant dense<0.000000e+00> : vector<8x32xf32>
    %118 = tpu.matmul %116, %117, %cst_38 {dimension_numbers = #tpu.dot_dimension_numbers<[1], [0], [0], [1], [0, 0, 1, 1], [], []>} : vector<8x8xf32>, vector<8x32xf32>, vector<8x32xf32> -> vector<8x32xf32>
    %119 = arith.addf %100, %118 : vector<8x32xf32>
    %c1 = arith.constant 1 : index
    %c0_39 = arith.constant 0 : index
    %c0_40 = arith.constant 0 : index
    %120 = vector.load %arg3[%c1, %c0_39, %c0_40] : memref<2x8x8xf32, #tpu.memory_space<vmem>>, vector<1x8x8xf32>
    %121 = vector.shape_cast %120 : vector<1x8x8xf32> to vector<8x8xf32>
    %122 = vector.extract_strided_slice %37 {offsets = [8, 0], sizes = [8, 32], strides = [1, 1]} : vector<16x32xf32> to vector<8x32xf32>
    %123 = vector.extract_strided_slice %38 {offsets = [8, 0], sizes = [8, 32], strides = [1, 1]} : vector<16x32xf32> to vector<8x32xf32>
    %124 = vector.extract_strided_slice %39 {offsets = [8, 0], sizes = [8, 32], strides = [1, 1]} : vector<16x32xf32> to vector<8x32xf32>
    %125 = vector.extract_strided_slice %122 {offsets = [0, 0], sizes = [8, 8], strides = [1, 1]} : vector<8x32xf32> to vector<8x8xf32>
    %126 = vector.extract_strided_slice %123 {offsets = [0, 0], sizes = [8, 8], strides = [1, 1]} : vector<8x32xf32> to vector<8x8xf32>
    %cst_41 = arith.constant dense<0.000000e+00> : vector<8x8xf32>
    %127 = tpu.matmul %125, %126, %cst_41 {dimension_numbers = #tpu.dot_dimension_numbers<[1], [1], [0], [0], [0, 0, 1, 0], [], []>} : vector<8x8xf32>, vector<8x8xf32>, vector<8x8xf32> -> vector<8x8xf32>
    %128 = arith.addf %127, %121 : vector<8x8xf32>
    %cst_42 = arith.constant dense<0xFF800000> : vector<8xf32>
    %129 = vector.multi_reduction <maximumf>, %128, %cst_42 [1] : vector<8x8xf32> to vector<8xf32>
    %130 = vector.shape_cast %129 : vector<8xf32> to vector<8x1xf32>
    %131 = vector.broadcast %130 : vector<8x1xf32> to vector<8x8xf32>
    %132 = arith.subf %128, %131 : vector<8x8xf32>
    %133 = math.exp %132 : vector<8x8xf32>
    %cst_43 = arith.constant dense<0.000000e+00> : vector<8xf32>
    %134 = vector.multi_reduction <add>, %133, %cst_43 [1] : vector<8x8xf32> to vector<8xf32>
    %135 = vector.shape_cast %134 : vector<8xf32> to vector<8x1xf32>
    %136 = tpu.reciprocal %135 {approx = true} : vector<8x1xf32> -> vector<8x1xf32>
    %137 = vector.broadcast %136 : vector<8x1xf32> to vector<8x8xf32>
    %138 = arith.mulf %133, %137 : vector<8x8xf32>
    %139 = vector.extract_strided_slice %124 {offsets = [0, 0], sizes = [8, 8], strides = [1, 1]} : vector<8x32xf32> to vector<8x8xf32>
    %cst_44 = arith.constant dense<0.000000e+00> : vector<8x8xf32>
    %140 = tpu.matmul %138, %139, %cst_44 {dimension_numbers = #tpu.dot_dimension_numbers<[1], [0], [0], [1], [0, 0, 1, 1], [], []>} : vector<8x8xf32>, vector<8x8xf32>, vector<8x8xf32> -> vector<8x8xf32>
    %141 = vector.extract_strided_slice %33 {offsets = [0, 0], sizes = [8, 32], strides = [1, 1]} : vector<32x32xf32> to vector<8x32xf32>
    %cst_45 = arith.constant dense<0.000000e+00> : vector<8x32xf32>
    %142 = tpu.matmul %140, %141, %cst_45 {dimension_numbers = #tpu.dot_dimension_numbers<[1], [0], [0], [1], [0, 0, 1, 1], [], []>} : vector<8x8xf32>, vector<8x32xf32>, vector<8x32xf32> -> vector<8x32xf32>
    %143 = vector.extract_strided_slice %122 {offsets = [0, 8], sizes = [8, 8], strides = [1, 1]} : vector<8x32xf32> to vector<8x8xf32>
    %144 = vector.extract_strided_slice %123 {offsets = [0, 8], sizes = [8, 8], strides = [1, 1]} : vector<8x32xf32> to vector<8x8xf32>
    %cst_46 = arith.constant dense<0.000000e+00> : vector<8x8xf32>
    %145 = tpu.matmul %143, %144, %cst_46 {dimension_numbers = #tpu.dot_dimension_numbers<[1], [1], [0], [0], [0, 0, 1, 0], [], []>} : vector<8x8xf32>, vector<8x8xf32>, vector<8x8xf32> -> vector<8x8xf32>
    %146 = arith.addf %145, %121 : vector<8x8xf32>
    %cst_47 = arith.constant dense<0xFF800000> : vector<8xf32>
    %147 = vector.multi_reduction <maximumf>, %146, %cst_47 [1] : vector<8x8xf32> to vector<8xf32>
    %148 = vector.shape_cast %147 : vector<8xf32> to vector<8x1xf32>
    %149 = vector.broadcast %148 : vector<8x1xf32> to vector<8x8xf32>
    %150 = arith.subf %146, %149 : vector<8x8xf32>
    %151 = math.exp %150 : vector<8x8xf32>
    %cst_48 = arith.constant dense<0.000000e+00> : vector<8xf32>
    %152 = vector.multi_reduction <add>, %151, %cst_48 [1] : vector<8x8xf32> to vector<8xf32>
    %153 = vector.shape_cast %152 : vector<8xf32> to vector<8x1xf32>
    %154 = tpu.reciprocal %153 {approx = true} : vector<8x1xf32> -> vector<8x1xf32>
    %155 = vector.broadcast %154 : vector<8x1xf32> to vector<8x8xf32>
    %156 = arith.mulf %151, %155 : vector<8x8xf32>
    %157 = vector.extract_strided_slice %124 {offsets = [0, 8], sizes = [8, 8], strides = [1, 1]} : vector<8x32xf32> to vector<8x8xf32>
    %cst_49 = arith.constant dense<0.000000e+00> : vector<8x8xf32>
    %158 = tpu.matmul %156, %157, %cst_49 {dimension_numbers = #tpu.dot_dimension_numbers<[1], [0], [0], [1], [0, 0, 1, 1], [], []>} : vector<8x8xf32>, vector<8x8xf32>, vector<8x8xf32> -> vector<8x8xf32>
    %159 = vector.extract_strided_slice %33 {offsets = [8, 0], sizes = [8, 32], strides = [1, 1]} : vector<32x32xf32> to vector<8x32xf32>
    %cst_50 = arith.constant dense<0.000000e+00> : vector<8x32xf32>
    %160 = tpu.matmul %158, %159, %cst_50 {dimension_numbers = #tpu.dot_dimension_numbers<[1], [0], [0], [1], [0, 0, 1, 1], [], []>} : vector<8x8xf32>, vector<8x32xf32>, vector<8x32xf32> -> vector<8x32xf32>
    %161 = arith.addf %142, %160 : vector<8x32xf32>
    %162 = vector.extract_strided_slice %122 {offsets = [0, 16], sizes = [8, 8], strides = [1, 1]} : vector<8x32xf32> to vector<8x8xf32>
    %163 = vector.extract_strided_slice %123 {offsets = [0, 16], sizes = [8, 8], strides = [1, 1]} : vector<8x32xf32> to vector<8x8xf32>
    %cst_51 = arith.constant dense<0.000000e+00> : vector<8x8xf32>
    %164 = tpu.matmul %162, %163, %cst_51 {dimension_numbers = #tpu.dot_dimension_numbers<[1], [1], [0], [0], [0, 0, 1, 0], [], []>} : vector<8x8xf32>, vector<8x8xf32>, vector<8x8xf32> -> vector<8x8xf32>
    %165 = arith.addf %164, %121 : vector<8x8xf32>
    %cst_52 = arith.constant dense<0xFF800000> : vector<8xf32>
    %166 = vector.multi_reduction <maximumf>, %165, %cst_52 [1] : vector<8x8xf32> to vector<8xf32>
    %167 = vector.shape_cast %166 : vector<8xf32> to vector<8x1xf32>
    %168 = vector.broadcast %167 : vector<8x1xf32> to vector<8x8xf32>
    %169 = arith.subf %165, %168 : vector<8x8xf32>
    %170 = math.exp %169 : vector<8x8xf32>
    %cst_53 = arith.constant dense<0.000000e+00> : vector<8xf32>
    %171 = vector.multi_reduction <add>, %170, %cst_53 [1] : vector<8x8xf32> to vector<8xf32>
    %172 = vector.shape_cast %171 : vector<8xf32> to vector<8x1xf32>
    %173 = tpu.reciprocal %172 {approx = true} : vector<8x1xf32> -> vector<8x1xf32>
    %174 = vector.broadcast %173 : vector<8x1xf32> to vector<8x8xf32>
    %175 = arith.mulf %170, %174 : vector<8x8xf32>
    %176 = vector.extract_strided_slice %124 {offsets = [0, 16], sizes = [8, 8], strides = [1, 1]} : vector<8x32xf32> to vector<8x8xf32>
    %cst_54 = arith.constant dense<0.000000e+00> : vector<8x8xf32>
    %177 = tpu.matmul %175, %176, %cst_54 {dimension_numbers = #tpu.dot_dimension_numbers<[1], [0], [0], [1], [0, 0, 1, 1], [], []>} : vector<8x8xf32>, vector<8x8xf32>, vector<8x8xf32> -> vector<8x8xf32>
    %178 = vector.extract_strided_slice %33 {offsets = [16, 0], sizes = [8, 32], strides = [1, 1]} : vector<32x32xf32> to vector<8x32xf32>
    %cst_55 = arith.constant dense<0.000000e+00> : vector<8x32xf32>
    %179 = tpu.matmul %177, %178, %cst_55 {dimension_numbers = #tpu.dot_dimension_numbers<[1], [0], [0], [1], [0, 0, 1, 1], [], []>} : vector<8x8xf32>, vector<8x32xf32>, vector<8x32xf32> -> vector<8x32xf32>
    %180 = arith.addf %161, %179 : vector<8x32xf32>
    %181 = vector.extract_strided_slice %122 {offsets = [0, 24], sizes = [8, 8], strides = [1, 1]} : vector<8x32xf32> to vector<8x8xf32>
    %182 = vector.extract_strided_slice %123 {offsets = [0, 24], sizes = [8, 8], strides = [1, 1]} : vector<8x32xf32> to vector<8x8xf32>
    %cst_56 = arith.constant dense<0.000000e+00> : vector<8x8xf32>
    %183 = tpu.matmul %181, %182, %cst_56 {dimension_numbers = #tpu.dot_dimension_numbers<[1], [1], [0], [0], [0, 0, 1, 0], [], []>} : vector<8x8xf32>, vector<8x8xf32>, vector<8x8xf32> -> vector<8x8xf32>
    %184 = arith.addf %183, %121 : vector<8x8xf32>
    %cst_57 = arith.constant dense<0xFF800000> : vector<8xf32>
    %185 = vector.multi_reduction <maximumf>, %184, %cst_57 [1] : vector<8x8xf32> to vector<8xf32>
    %186 = vector.shape_cast %185 : vector<8xf32> to vector<8x1xf32>
    %187 = vector.broadcast %186 : vector<8x1xf32> to vector<8x8xf32>
    %188 = arith.subf %184, %187 : vector<8x8xf32>
    %189 = math.exp %188 : vector<8x8xf32>
    %cst_58 = arith.constant dense<0.000000e+00> : vector<8xf32>
    %190 = vector.multi_reduction <add>, %189, %cst_58 [1] : vector<8x8xf32> to vector<8xf32>
    %191 = vector.shape_cast %190 : vector<8xf32> to vector<8x1xf32>
    %192 = tpu.reciprocal %191 {approx = true} : vector<8x1xf32> -> vector<8x1xf32>
    %193 = vector.broadcast %192 : vector<8x1xf32> to vector<8x8xf32>
    %194 = arith.mulf %189, %193 : vector<8x8xf32>
    %195 = vector.extract_strided_slice %124 {offsets = [0, 24], sizes = [8, 8], strides = [1, 1]} : vector<8x32xf32> to vector<8x8xf32>
    %cst_59 = arith.constant dense<0.000000e+00> : vector<8x8xf32>
    %196 = tpu.matmul %194, %195, %cst_59 {dimension_numbers = #tpu.dot_dimension_numbers<[1], [0], [0], [1], [0, 0, 1, 1], [], []>} : vector<8x8xf32>, vector<8x8xf32>, vector<8x8xf32> -> vector<8x8xf32>
    %197 = vector.extract_strided_slice %33 {offsets = [24, 0], sizes = [8, 32], strides = [1, 1]} : vector<32x32xf32> to vector<8x32xf32>
    %cst_60 = arith.constant dense<0.000000e+00> : vector<8x32xf32>
    %198 = tpu.matmul %196, %197, %cst_60 {dimension_numbers = #tpu.dot_dimension_numbers<[1], [0], [0], [1], [0, 0, 1, 1], [], []>} : vector<8x8xf32>, vector<8x32xf32>, vector<8x32xf32> -> vector<8x32xf32>
    %199 = arith.addf %180, %198 : vector<8x32xf32>
    %200 = tpu.concatenate %119, %199 in 0 : vector<8x32xf32>, vector<8x32xf32> -> vector<16x32xf32>
    %201 = vector.broadcast %6 : vector<1x32xf32> to vector<16x32xf32>
    %202 = arith.addf %200, %201 : vector<16x32xf32>
    %203 = arith.addf %0, %202 : vector<16x32xf32>
    %204 = vector.extract_strided_slice %3 {offsets = [2, 0], sizes = [1, 32], strides = [1, 1]} : vector<6x32xf32> to vector<1x32xf32>
    %205 = vector.extract_strided_slice %3 {offsets = [3, 0], sizes = [1, 32], strides = [1, 1]} : vector<6x32xf32> to vector<1x32xf32>
    %cst_61 = arith.constant dense<0.000000e+00> : vector<16xf32>
    %206 = vector.multi_reduction <add>, %203, %cst_61 [1] : vector<16x32xf32> to vector<16xf32>
    %207 = vector.shape_cast %206 : vector<16xf32> to vector<16x1xf32>
    %cst_62 = arith.constant 3.200000e+01 : f32
    %208 = vector.broadcast %cst_62 : f32 to vector<16x1xf32>
    %209 = arith.divf %207, %208 : vector<16x1xf32>
    %210 = vector.broadcast %209 : vector<16x1xf32> to vector<16x32xf32>
    %211 = arith.subf %203, %210 : vector<16x32xf32>
    %212 = arith.mulf %211, %211 : vector<16x32xf32>
    %cst_63 = arith.constant dense<0.000000e+00> : vector<16xf32>
    %213 = vector.multi_reduction <add>, %212, %cst_63 [1] : vector<16x32xf32> to vector<16xf32>
    %214 = vector.shape_cast %213 : vector<16xf32> to vector<16x1xf32>
    %cst_64 = arith.constant 3.200000e+01 : f32
    %215 = vector.broadcast %cst_64 : f32 to vector<16x1xf32>
    %216 = arith.divf %214, %215 : vector<16x1xf32>
    %cst_65 = arith.constant 9.99999974E-6 : f32
    %217 = vector.broadcast %cst_65 : f32 to vector<16x1xf32>
    %218 = arith.addf %216, %217 : vector<16x1xf32>
    %219 = math.rsqrt %218 : vector<16x1xf32>
    %220 = vector.broadcast %219 : vector<16x1xf32> to vector<16x32xf32>
    %221 = arith.mulf %211, %220 : vector<16x32xf32>
    %222 = vector.broadcast %204 : vector<1x32xf32> to vector<16x32xf32>
    %223 = arith.mulf %221, %222 : vector<16x32xf32>
    %224 = vector.broadcast %205 : vector<1x32xf32> to vector<16x32xf32>
    %225 = arith.addf %223, %224 : vector<16x32xf32>
    %c0_66 = arith.constant 0 : index
    %c0_67 = arith.constant 0 : index
    %226 = vector.load %arg7[%c0_66, %c0_67] : memref<32x96xf32, #tpu.memory_space<vmem>>, vector<32x96xf32>
    %c0_68 = arith.constant 0 : index
    %c0_69 = arith.constant 0 : index
    %227 = vector.load %arg8[%c0_68, %c0_69] : memref<32x32xf32, #tpu.memory_space<vmem>>, vector<32x32xf32>
    %228 = vector.extract_strided_slice %226 {offsets = [0, 0], sizes = [32, 32], strides = [1, 1]} : vector<32x96xf32> to vector<32x32xf32>
    %cst_70 = arith.constant dense<0.000000e+00> : vector<16x32xf32>
    %229 = tpu.matmul %225, %228, %cst_70 {dimension_numbers = #tpu.dot_dimension_numbers<[1], [0], [0], [1], [0, 0, 1, 1], [], []>} : vector<16x32xf32>, vector<32x32xf32>, vector<16x32xf32> -> vector<16x32xf32>
    %230 = vector.extract_strided_slice %5 {offsets = [0, 0], sizes = [1, 32], strides = [1, 1]} : vector<1x96xf32> to vector<1x32xf32>
    %231 = vector.broadcast %230 : vector<1x32xf32> to vector<16x32xf32>
    %232 = arith.addf %229, %231 : vector<16x32xf32>
    %233 = vector.extract_strided_slice %226 {offsets = [0, 32], sizes = [32, 64], strides = [1, 1]} : vector<32x96xf32> to vector<32x64xf32>
    %cst_71 = arith.constant dense<0.000000e+00> : vector<16x64xf32>
    %234 = tpu.matmul %1, %233, %cst_71 {dimension_numbers = #tpu.dot_dimension_numbers<[1], [0], [0], [1], [0, 0, 1, 1], [], []>} : vector<16x32xf32>, vector<32x64xf32>, vector<16x64xf32> -> vector<16x64xf32>
    %235 = vector.extract_strided_slice %5 {offsets = [0, 32], sizes = [1, 64], strides = [1, 1]} : vector<1x96xf32> to vector<1x64xf32>
    %236 = vector.broadcast %235 : vector<1x64xf32> to vector<16x64xf32>
    %237 = arith.addf %234, %236 : vector<16x64xf32>
    %238 = vector.extract_strided_slice %237 {offsets = [0, 0], sizes = [16, 32], strides = [1, 1]} : vector<16x64xf32> to vector<16x32xf32>
    %239 = vector.extract_strided_slice %237 {offsets = [0, 32], sizes = [16, 32], strides = [1, 1]} : vector<16x64xf32> to vector<16x32xf32>
    %c0_72 = arith.constant 0 : index
    %c0_73 = arith.constant 0 : index
    %c0_74 = arith.constant 0 : index
    %240 = vector.load %arg4[%c0_72, %c0_73, %c0_74] : memref<2x8x8xf32, #tpu.memory_space<vmem>>, vector<1x8x8xf32>
    %241 = vector.shape_cast %240 : vector<1x8x8xf32> to vector<8x8xf32>
    %242 = vector.extract_strided_slice %232 {offsets = [0, 0], sizes = [8, 32], strides = [1, 1]} : vector<16x32xf32> to vector<8x32xf32>
    %243 = vector.extract_strided_slice %238 {offsets = [0, 0], sizes = [8, 32], strides = [1, 1]} : vector<16x32xf32> to vector<8x32xf32>
    %244 = vector.extract_strided_slice %239 {offsets = [0, 0], sizes = [8, 32], strides = [1, 1]} : vector<16x32xf32> to vector<8x32xf32>
    %245 = vector.extract_strided_slice %242 {offsets = [0, 0], sizes = [8, 8], strides = [1, 1]} : vector<8x32xf32> to vector<8x8xf32>
    %246 = vector.extract_strided_slice %243 {offsets = [0, 0], sizes = [8, 8], strides = [1, 1]} : vector<8x32xf32> to vector<8x8xf32>
    %cst_75 = arith.constant dense<0.000000e+00> : vector<8x8xf32>
    %247 = tpu.matmul %245, %246, %cst_75 {dimension_numbers = #tpu.dot_dimension_numbers<[1], [1], [0], [0], [0, 0, 1, 0], [], []>} : vector<8x8xf32>, vector<8x8xf32>, vector<8x8xf32> -> vector<8x8xf32>
    %248 = arith.addf %247, %241 : vector<8x8xf32>
    %cst_76 = arith.constant dense<0xFF800000> : vector<8xf32>
    %249 = vector.multi_reduction <maximumf>, %248, %cst_76 [1] : vector<8x8xf32> to vector<8xf32>
    %250 = vector.shape_cast %249 : vector<8xf32> to vector<8x1xf32>
    %251 = vector.broadcast %250 : vector<8x1xf32> to vector<8x8xf32>
    %252 = arith.subf %248, %251 : vector<8x8xf32>
    %253 = math.exp %252 : vector<8x8xf32>
    %cst_77 = arith.constant dense<0.000000e+00> : vector<8xf32>
    %254 = vector.multi_reduction <add>, %253, %cst_77 [1] : vector<8x8xf32> to vector<8xf32>
    %255 = vector.shape_cast %254 : vector<8xf32> to vector<8x1xf32>
    %256 = tpu.reciprocal %255 {approx = true} : vector<8x1xf32> -> vector<8x1xf32>
    %257 = vector.broadcast %256 : vector<8x1xf32> to vector<8x8xf32>
    %258 = arith.mulf %253, %257 : vector<8x8xf32>
    %259 = vector.extract_strided_slice %244 {offsets = [0, 0], sizes = [8, 8], strides = [1, 1]} : vector<8x32xf32> to vector<8x8xf32>
    %cst_78 = arith.constant dense<0.000000e+00> : vector<8x8xf32>
    %260 = tpu.matmul %258, %259, %cst_78 {dimension_numbers = #tpu.dot_dimension_numbers<[1], [0], [0], [1], [0, 0, 1, 1], [], []>} : vector<8x8xf32>, vector<8x8xf32>, vector<8x8xf32> -> vector<8x8xf32>
    %261 = vector.extract_strided_slice %227 {offsets = [0, 0], sizes = [8, 32], strides = [1, 1]} : vector<32x32xf32> to vector<8x32xf32>
    %cst_79 = arith.constant dense<0.000000e+00> : vector<8x32xf32>
    %262 = tpu.matmul %260, %261, %cst_79 {dimension_numbers = #tpu.dot_dimension_numbers<[1], [0], [0], [1], [0, 0, 1, 1], [], []>} : vector<8x8xf32>, vector<8x32xf32>, vector<8x32xf32> -> vector<8x32xf32>
    %263 = vector.extract_strided_slice %242 {offsets = [0, 8], sizes = [8, 8], strides = [1, 1]} : vector<8x32xf32> to vector<8x8xf32>
    %264 = vector.extract_strided_slice %243 {offsets = [0, 8], sizes = [8, 8], strides = [1, 1]} : vector<8x32xf32> to vector<8x8xf32>
    %cst_80 = arith.constant dense<0.000000e+00> : vector<8x8xf32>
    %265 = tpu.matmul %263, %264, %cst_80 {dimension_numbers = #tpu.dot_dimension_numbers<[1], [1], [0], [0], [0, 0, 1, 0], [], []>} : vector<8x8xf32>, vector<8x8xf32>, vector<8x8xf32> -> vector<8x8xf32>
    %266 = arith.addf %265, %241 : vector<8x8xf32>
    %cst_81 = arith.constant dense<0xFF800000> : vector<8xf32>
    %267 = vector.multi_reduction <maximumf>, %266, %cst_81 [1] : vector<8x8xf32> to vector<8xf32>
    %268 = vector.shape_cast %267 : vector<8xf32> to vector<8x1xf32>
    %269 = vector.broadcast %268 : vector<8x1xf32> to vector<8x8xf32>
    %270 = arith.subf %266, %269 : vector<8x8xf32>
    %271 = math.exp %270 : vector<8x8xf32>
    %cst_82 = arith.constant dense<0.000000e+00> : vector<8xf32>
    %272 = vector.multi_reduction <add>, %271, %cst_82 [1] : vector<8x8xf32> to vector<8xf32>
    %273 = vector.shape_cast %272 : vector<8xf32> to vector<8x1xf32>
    %274 = tpu.reciprocal %273 {approx = true} : vector<8x1xf32> -> vector<8x1xf32>
    %275 = vector.broadcast %274 : vector<8x1xf32> to vector<8x8xf32>
    %276 = arith.mulf %271, %275 : vector<8x8xf32>
    %277 = vector.extract_strided_slice %244 {offsets = [0, 8], sizes = [8, 8], strides = [1, 1]} : vector<8x32xf32> to vector<8x8xf32>
    %cst_83 = arith.constant dense<0.000000e+00> : vector<8x8xf32>
    %278 = tpu.matmul %276, %277, %cst_83 {dimension_numbers = #tpu.dot_dimension_numbers<[1], [0], [0], [1], [0, 0, 1, 1], [], []>} : vector<8x8xf32>, vector<8x8xf32>, vector<8x8xf32> -> vector<8x8xf32>
    %279 = vector.extract_strided_slice %227 {offsets = [8, 0], sizes = [8, 32], strides = [1, 1]} : vector<32x32xf32> to vector<8x32xf32>
    %cst_84 = arith.constant dense<0.000000e+00> : vector<8x32xf32>
    %280 = tpu.matmul %278, %279, %cst_84 {dimension_numbers = #tpu.dot_dimension_numbers<[1], [0], [0], [1], [0, 0, 1, 1], [], []>} : vector<8x8xf32>, vector<8x32xf32>, vector<8x32xf32> -> vector<8x32xf32>
    %281 = arith.addf %262, %280 : vector<8x32xf32>
    %282 = vector.extract_strided_slice %242 {offsets = [0, 16], sizes = [8, 8], strides = [1, 1]} : vector<8x32xf32> to vector<8x8xf32>
    %283 = vector.extract_strided_slice %243 {offsets = [0, 16], sizes = [8, 8], strides = [1, 1]} : vector<8x32xf32> to vector<8x8xf32>
    %cst_85 = arith.constant dense<0.000000e+00> : vector<8x8xf32>
    %284 = tpu.matmul %282, %283, %cst_85 {dimension_numbers = #tpu.dot_dimension_numbers<[1], [1], [0], [0], [0, 0, 1, 0], [], []>} : vector<8x8xf32>, vector<8x8xf32>, vector<8x8xf32> -> vector<8x8xf32>
    %285 = arith.addf %284, %241 : vector<8x8xf32>
    %cst_86 = arith.constant dense<0xFF800000> : vector<8xf32>
    %286 = vector.multi_reduction <maximumf>, %285, %cst_86 [1] : vector<8x8xf32> to vector<8xf32>
    %287 = vector.shape_cast %286 : vector<8xf32> to vector<8x1xf32>
    %288 = vector.broadcast %287 : vector<8x1xf32> to vector<8x8xf32>
    %289 = arith.subf %285, %288 : vector<8x8xf32>
    %290 = math.exp %289 : vector<8x8xf32>
    %cst_87 = arith.constant dense<0.000000e+00> : vector<8xf32>
    %291 = vector.multi_reduction <add>, %290, %cst_87 [1] : vector<8x8xf32> to vector<8xf32>
    %292 = vector.shape_cast %291 : vector<8xf32> to vector<8x1xf32>
    %293 = tpu.reciprocal %292 {approx = true} : vector<8x1xf32> -> vector<8x1xf32>
    %294 = vector.broadcast %293 : vector<8x1xf32> to vector<8x8xf32>
    %295 = arith.mulf %290, %294 : vector<8x8xf32>
    %296 = vector.extract_strided_slice %244 {offsets = [0, 16], sizes = [8, 8], strides = [1, 1]} : vector<8x32xf32> to vector<8x8xf32>
    %cst_88 = arith.constant dense<0.000000e+00> : vector<8x8xf32>
    %297 = tpu.matmul %295, %296, %cst_88 {dimension_numbers = #tpu.dot_dimension_numbers<[1], [0], [0], [1], [0, 0, 1, 1], [], []>} : vector<8x8xf32>, vector<8x8xf32>, vector<8x8xf32> -> vector<8x8xf32>
    %298 = vector.extract_strided_slice %227 {offsets = [16, 0], sizes = [8, 32], strides = [1, 1]} : vector<32x32xf32> to vector<8x32xf32>
    %cst_89 = arith.constant dense<0.000000e+00> : vector<8x32xf32>
    %299 = tpu.matmul %297, %298, %cst_89 {dimension_numbers = #tpu.dot_dimension_numbers<[1], [0], [0], [1], [0, 0, 1, 1], [], []>} : vector<8x8xf32>, vector<8x32xf32>, vector<8x32xf32> -> vector<8x32xf32>
    %300 = arith.addf %281, %299 : vector<8x32xf32>
    %301 = vector.extract_strided_slice %242 {offsets = [0, 24], sizes = [8, 8], strides = [1, 1]} : vector<8x32xf32> to vector<8x8xf32>
    %302 = vector.extract_strided_slice %243 {offsets = [0, 24], sizes = [8, 8], strides = [1, 1]} : vector<8x32xf32> to vector<8x8xf32>
    %cst_90 = arith.constant dense<0.000000e+00> : vector<8x8xf32>
    %303 = tpu.matmul %301, %302, %cst_90 {dimension_numbers = #tpu.dot_dimension_numbers<[1], [1], [0], [0], [0, 0, 1, 0], [], []>} : vector<8x8xf32>, vector<8x8xf32>, vector<8x8xf32> -> vector<8x8xf32>
    %304 = arith.addf %303, %241 : vector<8x8xf32>
    %cst_91 = arith.constant dense<0xFF800000> : vector<8xf32>
    %305 = vector.multi_reduction <maximumf>, %304, %cst_91 [1] : vector<8x8xf32> to vector<8xf32>
    %306 = vector.shape_cast %305 : vector<8xf32> to vector<8x1xf32>
    %307 = vector.broadcast %306 : vector<8x1xf32> to vector<8x8xf32>
    %308 = arith.subf %304, %307 : vector<8x8xf32>
    %309 = math.exp %308 : vector<8x8xf32>
    %cst_92 = arith.constant dense<0.000000e+00> : vector<8xf32>
    %310 = vector.multi_reduction <add>, %309, %cst_92 [1] : vector<8x8xf32> to vector<8xf32>
    %311 = vector.shape_cast %310 : vector<8xf32> to vector<8x1xf32>
    %312 = tpu.reciprocal %311 {approx = true} : vector<8x1xf32> -> vector<8x1xf32>
    %313 = vector.broadcast %312 : vector<8x1xf32> to vector<8x8xf32>
    %314 = arith.mulf %309, %313 : vector<8x8xf32>
    %315 = vector.extract_strided_slice %244 {offsets = [0, 24], sizes = [8, 8], strides = [1, 1]} : vector<8x32xf32> to vector<8x8xf32>
    %cst_93 = arith.constant dense<0.000000e+00> : vector<8x8xf32>
    %316 = tpu.matmul %314, %315, %cst_93 {dimension_numbers = #tpu.dot_dimension_numbers<[1], [0], [0], [1], [0, 0, 1, 1], [], []>} : vector<8x8xf32>, vector<8x8xf32>, vector<8x8xf32> -> vector<8x8xf32>
    %317 = vector.extract_strided_slice %227 {offsets = [24, 0], sizes = [8, 32], strides = [1, 1]} : vector<32x32xf32> to vector<8x32xf32>
    %cst_94 = arith.constant dense<0.000000e+00> : vector<8x32xf32>
    %318 = tpu.matmul %316, %317, %cst_94 {dimension_numbers = #tpu.dot_dimension_numbers<[1], [0], [0], [1], [0, 0, 1, 1], [], []>} : vector<8x8xf32>, vector<8x32xf32>, vector<8x32xf32> -> vector<8x32xf32>
    %319 = arith.addf %300, %318 : vector<8x32xf32>
    %c1_95 = arith.constant 1 : index
    %c0_96 = arith.constant 0 : index
    %c0_97 = arith.constant 0 : index
    %320 = vector.load %arg4[%c1_95, %c0_96, %c0_97] : memref<2x8x8xf32, #tpu.memory_space<vmem>>, vector<1x8x8xf32>
    %321 = vector.shape_cast %320 : vector<1x8x8xf32> to vector<8x8xf32>
    %322 = vector.extract_strided_slice %232 {offsets = [8, 0], sizes = [8, 32], strides = [1, 1]} : vector<16x32xf32> to vector<8x32xf32>
    %323 = vector.extract_strided_slice %238 {offsets = [8, 0], sizes = [8, 32], strides = [1, 1]} : vector<16x32xf32> to vector<8x32xf32>
    %324 = vector.extract_strided_slice %239 {offsets = [8, 0], sizes = [8, 32], strides = [1, 1]} : vector<16x32xf32> to vector<8x32xf32>
    %325 = vector.extract_strided_slice %322 {offsets = [0, 0], sizes = [8, 8], strides = [1, 1]} : vector<8x32xf32> to vector<8x8xf32>
    %326 = vector.extract_strided_slice %323 {offsets = [0, 0], sizes = [8, 8], strides = [1, 1]} : vector<8x32xf32> to vector<8x8xf32>
    %cst_98 = arith.constant dense<0.000000e+00> : vector<8x8xf32>
    %327 = tpu.matmul %325, %326, %cst_98 {dimension_numbers = #tpu.dot_dimension_numbers<[1], [1], [0], [0], [0, 0, 1, 0], [], []>} : vector<8x8xf32>, vector<8x8xf32>, vector<8x8xf32> -> vector<8x8xf32>
    %328 = arith.addf %327, %321 : vector<8x8xf32>
    %cst_99 = arith.constant dense<0xFF800000> : vector<8xf32>
    %329 = vector.multi_reduction <maximumf>, %328, %cst_99 [1] : vector<8x8xf32> to vector<8xf32>
    %330 = vector.shape_cast %329 : vector<8xf32> to vector<8x1xf32>
    %331 = vector.broadcast %330 : vector<8x1xf32> to vector<8x8xf32>
    %332 = arith.subf %328, %331 : vector<8x8xf32>
    %333 = math.exp %332 : vector<8x8xf32>
    %cst_100 = arith.constant dense<0.000000e+00> : vector<8xf32>
    %334 = vector.multi_reduction <add>, %333, %cst_100 [1] : vector<8x8xf32> to vector<8xf32>
    %335 = vector.shape_cast %334 : vector<8xf32> to vector<8x1xf32>
    %336 = tpu.reciprocal %335 {approx = true} : vector<8x1xf32> -> vector<8x1xf32>
    %337 = vector.broadcast %336 : vector<8x1xf32> to vector<8x8xf32>
    %338 = arith.mulf %333, %337 : vector<8x8xf32>
    %339 = vector.extract_strided_slice %324 {offsets = [0, 0], sizes = [8, 8], strides = [1, 1]} : vector<8x32xf32> to vector<8x8xf32>
    %cst_101 = arith.constant dense<0.000000e+00> : vector<8x8xf32>
    %340 = tpu.matmul %338, %339, %cst_101 {dimension_numbers = #tpu.dot_dimension_numbers<[1], [0], [0], [1], [0, 0, 1, 1], [], []>} : vector<8x8xf32>, vector<8x8xf32>, vector<8x8xf32> -> vector<8x8xf32>
    %341 = vector.extract_strided_slice %227 {offsets = [0, 0], sizes = [8, 32], strides = [1, 1]} : vector<32x32xf32> to vector<8x32xf32>
    %cst_102 = arith.constant dense<0.000000e+00> : vector<8x32xf32>
    %342 = tpu.matmul %340, %341, %cst_102 {dimension_numbers = #tpu.dot_dimension_numbers<[1], [0], [0], [1], [0, 0, 1, 1], [], []>} : vector<8x8xf32>, vector<8x32xf32>, vector<8x32xf32> -> vector<8x32xf32>
    %343 = vector.extract_strided_slice %322 {offsets = [0, 8], sizes = [8, 8], strides = [1, 1]} : vector<8x32xf32> to vector<8x8xf32>
    %344 = vector.extract_strided_slice %323 {offsets = [0, 8], sizes = [8, 8], strides = [1, 1]} : vector<8x32xf32> to vector<8x8xf32>
    %cst_103 = arith.constant dense<0.000000e+00> : vector<8x8xf32>
    %345 = tpu.matmul %343, %344, %cst_103 {dimension_numbers = #tpu.dot_dimension_numbers<[1], [1], [0], [0], [0, 0, 1, 0], [], []>} : vector<8x8xf32>, vector<8x8xf32>, vector<8x8xf32> -> vector<8x8xf32>
    %346 = arith.addf %345, %321 : vector<8x8xf32>
    %cst_104 = arith.constant dense<0xFF800000> : vector<8xf32>
    %347 = vector.multi_reduction <maximumf>, %346, %cst_104 [1] : vector<8x8xf32> to vector<8xf32>
    %348 = vector.shape_cast %347 : vector<8xf32> to vector<8x1xf32>
    %349 = vector.broadcast %348 : vector<8x1xf32> to vector<8x8xf32>
    %350 = arith.subf %346, %349 : vector<8x8xf32>
    %351 = math.exp %350 : vector<8x8xf32>
    %cst_105 = arith.constant dense<0.000000e+00> : vector<8xf32>
    %352 = vector.multi_reduction <add>, %351, %cst_105 [1] : vector<8x8xf32> to vector<8xf32>
    %353 = vector.shape_cast %352 : vector<8xf32> to vector<8x1xf32>
    %354 = tpu.reciprocal %353 {approx = true} : vector<8x1xf32> -> vector<8x1xf32>
    %355 = vector.broadcast %354 : vector<8x1xf32> to vector<8x8xf32>
    %356 = arith.mulf %351, %355 : vector<8x8xf32>
    %357 = vector.extract_strided_slice %324 {offsets = [0, 8], sizes = [8, 8], strides = [1, 1]} : vector<8x32xf32> to vector<8x8xf32>
    %cst_106 = arith.constant dense<0.000000e+00> : vector<8x8xf32>
    %358 = tpu.matmul %356, %357, %cst_106 {dimension_numbers = #tpu.dot_dimension_numbers<[1], [0], [0], [1], [0, 0, 1, 1], [], []>} : vector<8x8xf32>, vector<8x8xf32>, vector<8x8xf32> -> vector<8x8xf32>
    %359 = vector.extract_strided_slice %227 {offsets = [8, 0], sizes = [8, 32], strides = [1, 1]} : vector<32x32xf32> to vector<8x32xf32>
    %cst_107 = arith.constant dense<0.000000e+00> : vector<8x32xf32>
    %360 = tpu.matmul %358, %359, %cst_107 {dimension_numbers = #tpu.dot_dimension_numbers<[1], [0], [0], [1], [0, 0, 1, 1], [], []>} : vector<8x8xf32>, vector<8x32xf32>, vector<8x32xf32> -> vector<8x32xf32>
    %361 = arith.addf %342, %360 : vector<8x32xf32>
    %362 = vector.extract_strided_slice %322 {offsets = [0, 16], sizes = [8, 8], strides = [1, 1]} : vector<8x32xf32> to vector<8x8xf32>
    %363 = vector.extract_strided_slice %323 {offsets = [0, 16], sizes = [8, 8], strides = [1, 1]} : vector<8x32xf32> to vector<8x8xf32>
    %cst_108 = arith.constant dense<0.000000e+00> : vector<8x8xf32>
    %364 = tpu.matmul %362, %363, %cst_108 {dimension_numbers = #tpu.dot_dimension_numbers<[1], [1], [0], [0], [0, 0, 1, 0], [], []>} : vector<8x8xf32>, vector<8x8xf32>, vector<8x8xf32> -> vector<8x8xf32>
    %365 = arith.addf %364, %321 : vector<8x8xf32>
    %cst_109 = arith.constant dense<0xFF800000> : vector<8xf32>
    %366 = vector.multi_reduction <maximumf>, %365, %cst_109 [1] : vector<8x8xf32> to vector<8xf32>
    %367 = vector.shape_cast %366 : vector<8xf32> to vector<8x1xf32>
    %368 = vector.broadcast %367 : vector<8x1xf32> to vector<8x8xf32>
    %369 = arith.subf %365, %368 : vector<8x8xf32>
    %370 = math.exp %369 : vector<8x8xf32>
    %cst_110 = arith.constant dense<0.000000e+00> : vector<8xf32>
    %371 = vector.multi_reduction <add>, %370, %cst_110 [1] : vector<8x8xf32> to vector<8xf32>
    %372 = vector.shape_cast %371 : vector<8xf32> to vector<8x1xf32>
    %373 = tpu.reciprocal %372 {approx = true} : vector<8x1xf32> -> vector<8x1xf32>
    %374 = vector.broadcast %373 : vector<8x1xf32> to vector<8x8xf32>
    %375 = arith.mulf %370, %374 : vector<8x8xf32>
    %376 = vector.extract_strided_slice %324 {offsets = [0, 16], sizes = [8, 8], strides = [1, 1]} : vector<8x32xf32> to vector<8x8xf32>
    %cst_111 = arith.constant dense<0.000000e+00> : vector<8x8xf32>
    %377 = tpu.matmul %375, %376, %cst_111 {dimension_numbers = #tpu.dot_dimension_numbers<[1], [0], [0], [1], [0, 0, 1, 1], [], []>} : vector<8x8xf32>, vector<8x8xf32>, vector<8x8xf32> -> vector<8x8xf32>
    %378 = vector.extract_strided_slice %227 {offsets = [16, 0], sizes = [8, 32], strides = [1, 1]} : vector<32x32xf32> to vector<8x32xf32>
    %cst_112 = arith.constant dense<0.000000e+00> : vector<8x32xf32>
    %379 = tpu.matmul %377, %378, %cst_112 {dimension_numbers = #tpu.dot_dimension_numbers<[1], [0], [0], [1], [0, 0, 1, 1], [], []>} : vector<8x8xf32>, vector<8x32xf32>, vector<8x32xf32> -> vector<8x32xf32>
    %380 = arith.addf %361, %379 : vector<8x32xf32>
    %381 = vector.extract_strided_slice %322 {offsets = [0, 24], sizes = [8, 8], strides = [1, 1]} : vector<8x32xf32> to vector<8x8xf32>
    %382 = vector.extract_strided_slice %323 {offsets = [0, 24], sizes = [8, 8], strides = [1, 1]} : vector<8x32xf32> to vector<8x8xf32>
    %cst_113 = arith.constant dense<0.000000e+00> : vector<8x8xf32>
    %383 = tpu.matmul %381, %382, %cst_113 {dimension_numbers = #tpu.dot_dimension_numbers<[1], [1], [0], [0], [0, 0, 1, 0], [], []>} : vector<8x8xf32>, vector<8x8xf32>, vector<8x8xf32> -> vector<8x8xf32>
    %384 = arith.addf %383, %321 : vector<8x8xf32>
    %cst_114 = arith.constant dense<0xFF800000> : vector<8xf32>
    %385 = vector.multi_reduction <maximumf>, %384, %cst_114 [1] : vector<8x8xf32> to vector<8xf32>
    %386 = vector.shape_cast %385 : vector<8xf32> to vector<8x1xf32>
    %387 = vector.broadcast %386 : vector<8x1xf32> to vector<8x8xf32>
    %388 = arith.subf %384, %387 : vector<8x8xf32>
    %389 = math.exp %388 : vector<8x8xf32>
    %cst_115 = arith.constant dense<0.000000e+00> : vector<8xf32>
    %390 = vector.multi_reduction <add>, %389, %cst_115 [1] : vector<8x8xf32> to vector<8xf32>
    %391 = vector.shape_cast %390 : vector<8xf32> to vector<8x1xf32>
    %392 = tpu.reciprocal %391 {approx = true} : vector<8x1xf32> -> vector<8x1xf32>
    %393 = vector.broadcast %392 : vector<8x1xf32> to vector<8x8xf32>
    %394 = arith.mulf %389, %393 : vector<8x8xf32>
    %395 = vector.extract_strided_slice %324 {offsets = [0, 24], sizes = [8, 8], strides = [1, 1]} : vector<8x32xf32> to vector<8x8xf32>
    %cst_116 = arith.constant dense<0.000000e+00> : vector<8x8xf32>
    %396 = tpu.matmul %394, %395, %cst_116 {dimension_numbers = #tpu.dot_dimension_numbers<[1], [0], [0], [1], [0, 0, 1, 1], [], []>} : vector<8x8xf32>, vector<8x8xf32>, vector<8x8xf32> -> vector<8x8xf32>
    %397 = vector.extract_strided_slice %227 {offsets = [24, 0], sizes = [8, 32], strides = [1, 1]} : vector<32x32xf32> to vector<8x32xf32>
    %cst_117 = arith.constant dense<0.000000e+00> : vector<8x32xf32>
    %398 = tpu.matmul %396, %397, %cst_117 {dimension_numbers = #tpu.dot_dimension_numbers<[1], [0], [0], [1], [0, 0, 1, 1], [], []>} : vector<8x8xf32>, vector<8x32xf32>, vector<8x32xf32> -> vector<8x32xf32>
    %399 = arith.addf %380, %398 : vector<8x32xf32>
    %400 = tpu.concatenate %319, %399 in 0 : vector<8x32xf32>, vector<8x32xf32> -> vector<16x32xf32>
    %401 = vector.broadcast %7 : vector<1x32xf32> to vector<16x32xf32>
    %402 = arith.addf %400, %401 : vector<16x32xf32>
    %403 = arith.addf %203, %402 : vector<16x32xf32>
    %404 = vector.extract_strided_slice %3 {offsets = [4, 0], sizes = [1, 32], strides = [1, 1]} : vector<6x32xf32> to vector<1x32xf32>
    %405 = vector.extract_strided_slice %3 {offsets = [5, 0], sizes = [1, 32], strides = [1, 1]} : vector<6x32xf32> to vector<1x32xf32>
    %cst_118 = arith.constant dense<0.000000e+00> : vector<16xf32>
    %406 = vector.multi_reduction <add>, %403, %cst_118 [1] : vector<16x32xf32> to vector<16xf32>
    %407 = vector.shape_cast %406 : vector<16xf32> to vector<16x1xf32>
    %cst_119 = arith.constant 3.200000e+01 : f32
    %408 = vector.broadcast %cst_119 : f32 to vector<16x1xf32>
    %409 = arith.divf %407, %408 : vector<16x1xf32>
    %410 = vector.broadcast %409 : vector<16x1xf32> to vector<16x32xf32>
    %411 = arith.subf %403, %410 : vector<16x32xf32>
    %412 = arith.mulf %411, %411 : vector<16x32xf32>
    %cst_120 = arith.constant dense<0.000000e+00> : vector<16xf32>
    %413 = vector.multi_reduction <add>, %412, %cst_120 [1] : vector<16x32xf32> to vector<16xf32>
    %414 = vector.shape_cast %413 : vector<16xf32> to vector<16x1xf32>
    %cst_121 = arith.constant 3.200000e+01 : f32
    %415 = vector.broadcast %cst_121 : f32 to vector<16x1xf32>
    %416 = arith.divf %414, %415 : vector<16x1xf32>
    %cst_122 = arith.constant 9.99999974E-6 : f32
    %417 = vector.broadcast %cst_122 : f32 to vector<16x1xf32>
    %418 = arith.addf %416, %417 : vector<16x1xf32>
    %419 = math.rsqrt %418 : vector<16x1xf32>
    %420 = vector.broadcast %419 : vector<16x1xf32> to vector<16x32xf32>
    %421 = arith.mulf %411, %420 : vector<16x32xf32>
    %422 = vector.broadcast %404 : vector<1x32xf32> to vector<16x32xf32>
    %423 = arith.mulf %421, %422 : vector<16x32xf32>
    %424 = vector.broadcast %405 : vector<1x32xf32> to vector<16x32xf32>
    %425 = arith.addf %423, %424 : vector<16x32xf32>
    %c0_123 = arith.constant 0 : index
    %c0_124 = arith.constant 0 : index
    %426 = vector.load %arg9[%c0_123, %c0_124] : memref<32x64xf32, #tpu.memory_space<vmem>>, vector<32x64xf32>
    %cst_125 = arith.constant dense<0.000000e+00> : vector<16x64xf32>
    %427 = tpu.matmul %425, %426, %cst_125 {dimension_numbers = #tpu.dot_dimension_numbers<[1], [0], [0], [1], [0, 0, 1, 1], [], []>} : vector<16x32xf32>, vector<32x64xf32>, vector<16x64xf32> -> vector<16x64xf32>
    %428 = vector.broadcast %8 : vector<1x64xf32> to vector<16x64xf32>
    %429 = arith.addf %427, %428 : vector<16x64xf32>
    %cst_126 = arith.constant 0.000000e+00 : f32
    %430 = vector.broadcast %cst_126 : f32 to vector<16x64xf32>
    %431 = arith.maximumf %429, %430 : vector<16x64xf32>
    %c0_127 = arith.constant 0 : index
    %c0_128 = arith.constant 0 : index
    %432 = vector.load %arg10[%c0_127, %c0_128] : memref<64x32xf32, #tpu.memory_space<vmem>>, vector<64x32xf32>
    %cst_129 = arith.constant dense<0.000000e+00> : vector<16x32xf32>
    %433 = tpu.matmul %431, %432, %cst_129 {dimension_numbers = #tpu.dot_dimension_numbers<[1], [0], [0], [1], [0, 0, 1, 1], [], []>} : vector<16x64xf32>, vector<64x32xf32>, vector<16x32xf32> -> vector<16x32xf32>
    %434 = arith.addf %403, %433 : vector<16x32xf32>
    %435 = vector.broadcast %9 : vector<1x32xf32> to vector<16x32xf32>
    %436 = arith.addf %434, %435 : vector<16x32xf32>
    %c0_130 = arith.constant 0 : index
    %c0_131 = arith.constant 0 : index
    %437 = vector.load %arg13[%c0_130, %c0_131] : memref<16x32xf32, #tpu.memory_space<vmem>>, vector<16x32xf32>
    tpu.vector_store %arg13[%c0_130, %c0_131], %436 {strides = array<i32>} : memref<16x32xf32, #tpu.memory_space<vmem>>, vector<16x32xf32>,
    return
  }
  func.func @transform_0(%arg0: i32) -> (i32, i32) {
    %c0_i32 = arith.constant 0 : i32
    %c0_i32_0 = arith.constant 0 : i32
    %c0_i32_1 = arith.constant 0 : i32
    return %c0_i32, %c0_i32_0 : i32, i32
  }
  func.func @transform_1(%arg0: i32) -> (i32, i32) {
    %c0_i32 = arith.constant 0 : i32
    %c0_i32_0 = arith.constant 0 : i32
    %c0_i32_1 = arith.constant 0 : i32
    return %c0_i32, %c0_i32_0 : i32, i32
  }
  func.func @transform_2(%arg0: i32) -> (i32, i32, i32) {
    %c0_i32 = arith.constant 0 : i32
    %c0_i32_0 = arith.constant 0 : i32
    %c0_i32_1 = arith.constant 0 : i32
    %c0_i32_2 = arith.constant 0 : i32
    return %c0_i32, %c0_i32_0, %c0_i32_1 : i32, i32, i32
  }
  func.func @transform_3(%arg0: i32) -> (i32, i32, i32) {
    %c0_i32 = arith.constant 0 : i32
    %c0_i32_0 = arith.constant 0 : i32
    %c0_i32_1 = arith.constant 0 : i32
    %c0_i32_2 = arith.constant 0 : i32
    return %c0_i32, %c0_i32_0, %c0_i32_1 : i32, i32, i32
  }
  func.func @transform_4(%arg0: i32) -> (i32, i32) {
    %c0_i32 = arith.constant 0 : i32
    %c0_i32_0 = arith.constant 0 : i32
    %c0_i32_1 = arith.constant 0 : i32
    return %c0_i32, %c0_i32_0 : i32, i32
  }
  func.func @transform_5(%arg0: i32) -> (i32, i32) {
    %c0_i32 = arith.constant 0 : i32
    %c0_i32_0 = arith.constant 0 : i32
    %c0_i32_1 = arith.constant 0 : i32
    return %c0_i32, %c0_i32_0 : i32, i32
  }
  func.func @transform_6(%arg0: i32) -> (i32, i32) {
    %c0_i32 = arith.constant 0 : i32
    %c0_i32_0 = arith.constant 0 : i32
    %c0_i32_1 = arith.constant 0 : i32
    return %c0_i32, %c0_i32_0 : i32, i32
  }
  func.func @transform_7(%arg0: i32) -> (i32, i32) {
    %c0_i32 = arith.constant 0 : i32
    %c0_i32_0 = arith.constant 0 : i32
    %c0_i32_1 = arith.constant 0 : i32
    return %c0_i32, %c0_i32_0 : i32, i32
  }
  func.func @transform_8(%arg0: i32) -> (i32, i32) {
    %c0_i32 = arith.constant 0 : i32
    %c0_i32_0 = arith.constant 0 : i32
    %c0_i32_1 = arith.constant 0 : i32
    return %c0_i32, %c0_i32_0 : i32, i32
  }
  func.func @transform_9(%arg0: i32) -> (i32, i32) {
    %c0_i32 = arith.constant 0 : i32
    %c0_i32_0 = arith.constant 0 : i32
    %c0_i32_1 = arith.constant 0 : i32
    return %c0_i32, %c0_i32_0 : i32, i32
  }
  func.func @transform_10(%arg0: i32) -> (i32, i32) {
    %c0_i32 = arith.constant 0 : i32
    %c0_i32_0 = arith.constant 0 : i32
    %c0_i32_1 = arith.constant 0 : i32
    return %c0_i32, %c0_i32_0 : i32, i32
  }
  func.func @transform_11(%arg0: i32) -> (i32, i32) {
    %c0_i32 = arith.constant 0 : i32
    %c0_i32_0 = arith.constant 0 : i32
    %c0_i32_1 = arith.constant 0 : i32
    return %c0_i32, %c0_i32_0 : i32, i32
  }
  func.func @transform_12(%arg0: i32) -> (i32, i32) {
    %c0_i32 = arith.constant 0 : i32
    %c0_i32_0 = arith.constant 0 : i32
    %c0_i32_1 = arith.constant 0 : i32
    return %c0_i32, %c0_i32_0 : i32, i32
  }
}

</mosaic_0001>

<bundles_post_ra>
// kernel: tpu_custom_call.1
= control target key start
LH: loop header
LB: loop body
LE: loop exit
PB: predicated region body
PF: predicated region fallthrough
CT: control target
= control target key end

     0   :  { %17 = vsyncpa [#allocation3], 0  ;;  %s6245_s0 = inlined_call_operand.hbm [shape: f32[16,32], index: 0, kind: input, shape index: {}]   ;;  %s6246_s1 = inlined_call_operand.hbm [shape: f32[16,32], index: 1, kind: input, shape index: {}]   ;;  %s6247_s2 = inlined_call_operand.hbm [shape: f32[2,8,8], index: 2, kind: input, shape index: {}]   ;;  %s6248_s3 = inlined_call_operand.hbm [shape: f32[2,8,8], index: 3, kind: input, shape index: {}]   ;;  %s6249_s4 = inlined_call_operand.vmem [shape: f32[32,96], index: 4, kind: input, shape index: {}]   ;;  %s6250_s5 = inlined_call_operand.vmem [shape: f32[32,32], index: 5, kind: input, shape index: {}]   ;;  %s6251_s6 = inlined_call_operand.vmem [shape: f32[32,96], index: 6, kind: input, shape index: {}]   ;;  %s6252_s7 = inlined_call_operand.hbm [shape: f32[32,32], index: 7, kind: input, shape index: {}]   ;;  %s6253_s8 = inlined_call_operand.hbm [shape: f32[32,64], index: 8, kind: input, shape index: {}]   ;;  %s6254_s9 = inlined_call_operand.vmem [shape: f32[64,32], index: 9, kind: input, shape index: {}]   ;;  %s6255_s10 = inlined_call_operand.hbm [shape: f32[6,96], index: 10, kind: input, shape index: {}]   ;;  %s6256_s11 = inlined_call_operand.vmem [shape: f32[6,32], index: 11, kind: input, shape index: {}]   ;;  %s6257_s12 = inlined_call_operand.hbm [shape: f32[16,32], index: 12, kind: output, shape index: {}]  }
   0x1   :  { %18 = vsyncpa [#allocation6], 0 }
   0x2   :  { %19 = vsyncpa [#allocation9], 0 }
   0x3   :  { %20 = vsyncpa [#allocation12], 0 }
   0x4   :  { %21 = vsyncpa [#allocation4], 0  ;;  %s5440_s21 = smov [#allocation5]   ;;  %s5441_s23 = smov [#allocation8]  }
   0x5   :  { %s39_s22 = sshll.u32 %s5440_s21, 4  ;;  %s63_s24 = sshll.u32 %s5441_s23, 4  ;;  %s40_s22 = int_to_ptr.vmem [resolvable:$true] %s39_s22  ;;  %s5528_s24 = int_to_ptr.vmem [resolvable:$true] %s63_s24 }
   0x6   :  { %s5254_s27 = scalar_lea.hbm %s6246_s1, 256 }
   0x7   :  { %p5255_p0 = scmp.ne.s32.totalorder %s6246_s1, %s5254_s27  ;;  %p5258_p1 = scmp.lt.u32.totalorder %s5254_s27, %s6246_s1 }
   0x9   :  { %p5260_p2 = pnand %p5258_p1, %p5255_p0 }
   0xb   :  { %5263 = shalt.err (!%p5260_p2)
}
   0xc   :  { %s5264_s14 = scalar_lea.vmem %s40_s22, 256  ;;  %p5269_p4 = scmp.lt.s32.totalorder %s40_s22, %s40_s22 }
   0xd   :  { %p5265_p3 = scmp.ne.s32.totalorder %s40_s22, %s5264_s14  ;;  %p5270_p5 = scmp.lt.s32.totalorder %s5264_s14, %s5264_s14 }
   0xf   :  { %p5271_p6 = por %p5270_p5, %p5269_p4 }
  0x11   :  { %p5272_p7 = pnand %p5271_p6, %p5265_p3 }
  0x13   :  { %5275 = shalt.err (!%p5272_p7)
}
  0x14   :  { %s5442_s15 = smov 128   ;;  %s5443_s16 = smov 8  }
  0x15   :  { %45 = dma.hbm_to_vmem [thread:$0]  %s6246_s1, 256, %s40_s22, [#allocation6], %s5442_s15, %s5442_s15, %s5443_s16  }
  0x16   :  { %s5276_s21 = scalar_lea.hbm %s6248_s3, 256 }
  0x17   :  { %p5277_p8 = scmp.ne.s32.totalorder %s6248_s3, %s5276_s21  ;;  %p5280_p9 = scmp.lt.u32.totalorder %s5276_s21, %s6248_s3 }
  0x19   :  { %p5282_p10 = pnand %p5280_p9, %p5277_p8 }
  0x1b   :  { %5285 = shalt.err (!%p5282_p10)
}
  0x1c   :  { %s5286_s28 = scalar_lea.vmem %s5528_s24, 256  ;;  %p5291_p12 = scmp.lt.s32.totalorder %s5528_s24, %s5528_s24 }
  0x1d   :  { %p5287_p11 = scmp.ne.s32.totalorder %s5528_s24, %s5286_s28  ;;  %p5292_p13 = scmp.lt.s32.totalorder %s5286_s28, %s5286_s28 }
  0x1f   :  { %p5293_p0 = por %p5292_p13, %p5291_p12 }
  0x21   :  { %p5294_p1 = pnand %p5293_p0, %p5287_p11 }
  0x23   :  { %5297 = shalt.err (!%p5294_p1)
}
  0x24   :  { %69 = dma.hbm_to_vmem [thread:$0]  %s6248_s3, 256, %s5528_s24, [#allocation9], %s5442_s15, %s5442_s15, %s5443_s16  }
  0x25   :  { %s5444_s29 = smov [#allocation11]   ;;  %s5445_s13 = smov [#allocation2]  }
  0x26   :  { %s93_s30 = sshll.u32 %s5444_s29, 4  ;;  %s27_s14 = sshll.u32 %s5445_s13, 4  ;;  %s94_s30 = int_to_ptr.vmem [resolvable:$true] %s93_s30  ;;  %s5565_s14 = int_to_ptr.vmem [resolvable:$true] %s27_s14 }
  0x27   :  { %s5298_s19 = scalar_lea.hbm %s6253_s8, 512 }
  0x28   :  { %p5299_p2 = scmp.ne.s32.totalorder %s6253_s8, %s5298_s19  ;;  %p5302_p3 = scmp.lt.u32.totalorder %s5298_s19, %s6253_s8 }
  0x2a   :  { %p5304_p4 = pnand %p5302_p3, %p5299_p2 }
  0x2c   :  { %5307 = shalt.err (!%p5304_p4)
}
  0x2d   :  { %s5308_s3 = scalar_lea.vmem %s94_s30, 512  ;;  %p5313_p6 = scmp.lt.s32.totalorder %s94_s30, %s94_s30 }
  0x2e   :  { %p5309_p5 = scmp.ne.s32.totalorder %s94_s30, %s5308_s3  ;;  %p5314_p7 = scmp.lt.s32.totalorder %s5308_s3, %s5308_s3 }
  0x30   :  { %p5315_p8 = por %p5314_p7, %p5313_p6 }
  0x32   :  { %p5316_p9 = pnand %p5315_p8, %p5309_p5 }
  0x34   :  { %5319 = shalt.err (!%p5316_p9)
}
  0x35   :  { %99 = dma.hbm_to_vmem [thread:$0]  %s6253_s8, 512, %s94_s30, [#allocation12], %s5442_s15, %s5442_s15, %s5443_s16  }
  0x36   :  { %s5320_s1 = scalar_lea.hbm %s6245_s0, 256 }
  0x37   :  { %p5321_p10 = scmp.ne.s32.totalorder %s6245_s0, %s5320_s1  ;;  %p5324_p11 = scmp.lt.u32.totalorder %s5320_s1, %s6245_s0 }
  0x39   :  { %p5326_p12 = pnand %p5324_p11, %p5321_p10 }
  0x3b   :  { %5329 = shalt.err (!%p5326_p12)
}
  0x3c   :  { %s5330_s18 = scalar_lea.vmem %s5565_s14, 256  ;;  %p5335_p0 = scmp.lt.s32.totalorder %s5565_s14, %s5565_s14 }
  0x3d   :  { %p5331_p13 = scmp.ne.s32.totalorder %s5565_s14, %s5330_s18  ;;  %p5336_p1 = scmp.lt.s32.totalorder %s5330_s18, %s5330_s18 }
  0x3f   :  { %p5337_p2 = por %p5336_p1, %p5335_p0 }
  0x41   :  { %p5338_p3 = pnand %p5337_p2, %p5331_p13 }
  0x43   :  { %5341 = shalt.err (!%p5338_p3)
}
  0x44   :  { %33 = dma.hbm_to_vmem [thread:$0]  %s6245_s0, 256, %s5565_s14, [#allocation3], %s5442_s15, %s5442_s15, %s5443_s16  }
  0x45   :  { %s5446_s19 = smov [#allocation7]   ;;  %s5447_s21 = smov [#allocation10]  }
  0x46   :  { %s51_s20 = sshll.u32 %s5446_s19, 4  ;;  %s81_s23 = sshll.u32 %s5447_s21, 4  ;;  %s52_s20 = int_to_ptr.vmem [resolvable:$true] %s51_s20  ;;  %s5602_s23 = int_to_ptr.vmem [resolvable:$true] %s81_s23 }
  0x47   :  { %s5342_s24 = scalar_lea.hbm %s6247_s2, 256 }
  0x48   :  { %p5343_p4 = scmp.ne.s32.totalorder %s6247_s2, %s5342_s24  ;;  %p5346_p5 = scmp.lt.u32.totalorder %s5342_s24, %s6247_s2 }
  0x4a   :  { %p5348_p6 = pnand %p5346_p5, %p5343_p4 }
  0x4c   :  { %5351 = shalt.err (!%p5348_p6)
}
  0x4d   :  { %s5352_s0 = scalar_lea.vmem %s52_s20, 256  ;;  %p5357_p8 = scmp.lt.s32.totalorder %s52_s20, %s52_s20 }
  0x4e   :  { %p5353_p7 = scmp.ne.s32.totalorder %s52_s20, %s5352_s0  ;;  %p5358_p9 = scmp.lt.s32.totalorder %s5352_s0, %s5352_s0 }
  0x50   :  { %p5359_p10 = por %p5358_p9, %p5357_p8 }
  0x52   :  { %p5360_p11 = pnand %p5359_p10, %p5353_p7 }
  0x54   :  { %5363 = shalt.err (!%p5360_p11)
}
  0x55   :  { %57 = dma.hbm_to_vmem [thread:$0]  %s6247_s2, 256, %s52_s20, [#allocation6], %s5442_s15, %s5442_s15, %s5443_s16  }
  0x56   :  { %s5364_s17 = scalar_lea.hbm %s6252_s7, 512 }
  0x57   :  { %p5365_p12 = scmp.ne.s32.totalorder %s6252_s7, %s5364_s17  ;;  %p5368_p13 = scmp.lt.u32.totalorder %s5364_s17, %s6252_s7 }
  0x59   :  { %p5370_p0 = pnand %p5368_p13, %p5365_p12 }
  0x5b   :  { %5373 = shalt.err (!%p5370_p0)
}
  0x5c   :  { %s5374_s21 = scalar_lea.vmem %s5602_s23, 512  ;;  %p5379_p2 = scmp.lt.s32.totalorder %s5602_s23, %s5602_s23 }
  0x5d   :  { %p5375_p1 = scmp.ne.s32.totalorder %s5602_s23, %s5374_s21  ;;  %p5380_p3 = scmp.lt.s32.totalorder %s5374_s21, %s5374_s21 }
  0x5f   :  { %p5381_p4 = por %p5380_p3, %p5379_p2 }
  0x61   :  { %p5382_p5 = pnand %p5381_p4, %p5375_p1 }
  0x63   :  { %5385 = shalt.err (!%p5382_p5)
}
  0x64   :  { %87 = dma.hbm_to_vmem [thread:$0]  %s6252_s7, 512, %s5602_s23, [#allocation9], %s5442_s15, %s5442_s15, %s5443_s16  }
  0x65   :  { %s5448_s25 = smov [#allocation13]   ;;  %s5386_s27 = scalar_lea.hbm %s6255_s10, 128 }
  0x66   :  { %s108_s3 = sshll.u32 %s5448_s25, 4  ;;  %p5387_p6 = scmp.ne.s32.totalorder %s6255_s10, %s5386_s27  ;;  %s109_s3 = int_to_ptr.vmem [resolvable:$true] %s108_s3 }
  0x67   :  { %p5390_p7 = scmp.lt.u32.totalorder %s5386_s27, %s6255_s10 }
  0x69   :  { %p5392_p8 = pnand %p5390_p7, %p5387_p6 }
  0x6b   :  { %5395 = shalt.err (!%p5392_p8)
}
  0x6c   :  { %s5396_s22 = scalar_lea.vmem %s109_s3, 128  ;;  %p5401_p10 = scmp.lt.s32.totalorder %s109_s3, %s109_s3 }
  0x6d   :  { %p5397_p9 = scmp.ne.s32.totalorder %s109_s3, %s5396_s22  ;;  %p5402_p11 = scmp.lt.s32.totalorder %s5396_s22, %s5396_s22 }
  0x6f   :  { %p5403_p12 = por %p5402_p11, %p5401_p10 }
  0x71   :  { %p5404_p13 = pnand %p5403_p12, %p5397_p9 }
  0x73   :  { %5407 = shalt.err (!%p5404_p13)
}
  0x74   :  { %111 = dma.hbm_to_vmem [thread:$0]  %s6255_s10, 128, %s109_s3, [#allocation12]  }
  0x75   :  { %5430 = dma.done.wait [#allocation3], 256  }
  0x76   :  { %5431 = vsyncadd [#allocation3], 4294967040 }
  0x77   :  { %5432 = dma.done.wait [#allocation6], 512  }
  0x78   :  { %5433 = vsyncadd [#allocation6], 4294966784 }
  0x79   :  { %5434 = dma.done.wait [#allocation9], 768  }
  0x7a   :  { %5435 = vsyncadd [#allocation9], 4294966528 }
  0x7b   :  { %5436 = dma.done.wait [#allocation12], 640  }
  0x7c   :  { %5437 = vsyncadd [#allocation12], 4294966656  ;;  %vm141_vm0 = vcmask 261120   ;;  %v5651_v0 = vld [vmem:[#allocation2] sm:$0xff]  ;;  %v5653_v1 = vld [vmem:[#allocation2 + $0x8] sm:$0xff]  ;;  %v169_v22 = vlaneseq  ;;  %v5449_v41 = vmov 0.0  }
  0x7d   :  { %v142_v2 = vsel %vm141_vm0, %v5651_v0, 0.0  ;;  %v145_v3 = vsel %vm141_vm0, %v5653_v1, 0.0  ;;  %v181_v14 = vld [vmem:[%s6249_s4] sm:$0xff]  ;;  %v182_v15 = vld [vmem:[%s6249_s4 + $0x8] sm:$0xff]  ;;  %v183_v16 = vld [vmem:[%s6249_s4 + $0x10] sm:$0xff]  ;;  %4808 = vmatprep.subr.mxu1 %v5449_v41  ;;  %vm5450_vm1 = vmmov 0  }
  0x7e   :  { %143 = vadd.xlane.f32.xlu0 %v142_v2  ;;  %v5095_v17 = vpack.c.bf16 %v182_v15, %v181_v14  ;;  %v184_v18 = vld [vmem:[%s6249_s4 + $0x18] sm:$0xff]  ;;  %v5675_v26 = vshrl.u32 %v169_v22, 7  ;;  %v5681_v29 = vld [vmem:[%s6256_s11] sm:$0x3f]  ;;  %4810 = vmatprep.mubr.msk.f32.mxu1 %vm5450_vm1, %v5449_v41  ;;  %s5451_s2 = smov 88   ;;  %s5452_s20 = smov 96  }
  0x7f   :  { %v5099_v19 = vpack.c.bf16 %v184_v18, %v183_v16  ;;  %v5696_v42 = vld [vmem:[#allocation13] sm:$0x3f]  ;;  %s5453_s25 = smov 120   ;;  %vm278_vm2 = vcmask 64512   ;;  %s5454_s3 = smov 64   ;;  %vm4476_vm3 = vcmask 523264  }
  0x80   :  { %5096 = vmatprep.subr.bf16.mxu0 %v5095_v17  ;;  %v171_v28 = vsub.s32 0, %v5675_v26  ;;  %v177_v30 = vsub.s32 1, %v5675_v26  ;;  %v5720_v51 = vld [vmem:[#allocation7] sm:$0xff]  ;;  %s5455_s24 = smov 80   ;;  %s5456_s26 = smov 112  }
  0x81   :  { %5098 = vmatpush3.bf16.msra.mxu0 %v5095_v17  ;;  %s5457_s27 = smov 56   ;;  %v5754_v17 = vld [vmem:[%s6250_s5] sm:$0xff]  ;;  %s5458_s22 = smov 72  }
  0x82   :  { %146 = vadd.xlane.f32.xlu0 %v145_v3  ;;  %5100 = vmatprep.subr.bf16.mxu0 %v5099_v19  ;;  %v172_v31 = vrot.slane %v5681_v29, %v171_v28  ;;  %v178_v34 = vrot.slane %v5681_v29, %v177_v30  ;;  %v192_v43 = vrot.slane %v5696_v42, %v171_v28  ;;  %s5459_s7 = smov 104   ;;  %s5460_s23 = smov 48  }
  0x83   :  { %s5461_s13 = smov 40  }
  0x85   :  { %5102 = vmatpush3.bf16.msra.mxu0 %v5099_v19 }
  0x86   :  { %4803 = vmatprep.subr.mxu0 %v5449_v41 }
 0x10b   :  { %v144_v4 = vpop.xlane.xlu0 %143 }
 0x10c   :  { %v149_v5 = vmul.f32 0.03125, %v144_v4 }
 0x10e   :  { %v151_v6 = vsub.f32 %v5651_v0, %v149_v5 }
 0x10f   :  { %v147_v7 = vpop.xlane.xlu0 %146 }
 0x110   :  { %v150_v8 = vmul.f32 0.03125, %v147_v7  ;;  %v153_v9 = vmul.f32 %v151_v6, %v151_v6 }
 0x112   :  { %v152_v10 = vsub.f32 %v5653_v1, %v150_v8  ;;  %v155_v11 = vsel %vm141_vm0, %v153_v9, 0.0  ;;  %v5740_v9 = vld [vmem:[%s6250_s5 + $0x8] sm:$0xff] }
 0x113   :  { %156 = vadd.xlane.f32.xlu1 %v155_v11 }
 0x114   :  { %v154_v12 = vmul.f32 %v152_v10, %v152_v10 }
 0x116   :  { %v158_v13 = vsel %vm141_vm0, %v154_v12, 0.0 }
 0x117   :  { %159 = vadd.xlane.f32.xlu1 %v158_v13 }
 0x1a0   :  { %v157_v20 = vpop.xlane.xlu1 %156 }
 0x1a1   :  { %v161_v21 = vmul.f32 0.03125, %v157_v20 }
 0x1a3   :  { %v163_v23 = vadd.f32 1e-05, %v161_v21 }
 0x1a4   :  { %v160_v24 = vpop.xlane.xlu1 %159 }
 0x1a5   :  { %5176 = vrsqrt.f32 %v163_v23  ;;  %v162_v25 = vmul.f32 0.03125, %v160_v24 }
 0x1a7   :  { %v164_v27 = vadd.f32 1e-05, %v162_v25 }
 0x1a9   :  { %5178 = vrsqrt.f32 %v164_v27 }
 0x1af   :  { %v5177_v32 = vpop.eup %5176 }
 0x1b0   :  { %v167_v33 = vmul.f32 %v5177_v32, %v151_v6 }
 0x1b2   :  { %v173_v35 = vmul.f32 %v172_v31, %v167_v33 }
 0x1b3   :  { %v5179_v36 = vpop.eup %5178 }
 0x1b4   :  { %v168_v37 = vmul.f32 %v5179_v36, %v152_v10  ;;  %v179_v38 = vadd.f32 %v178_v34, %v173_v35 }
 0x1b6   :  { %v174_v39 = vmul.f32 %v172_v31, %v168_v37  ;;  %4800 = vmatprep.mubr.msk.f32.mxu0 %vm141_vm0, %v179_v38 }
 0x1b8   :  { %v180_v40 = vadd.f32 %v178_v34, %v174_v39 }
 0x1ba   :  { %4801 = vmatmul.mubr.msk.f32.vlgmr.msra.gmra.mrb[0].mxu0 %vm141_vm0, %v180_v40 }
 0x1bb   :  { %4805 = vmatprep.mubr.msk.f32.mxu0 %vm5450_vm1, %v5449_v41 }
 0x28d   :  { %v4802_v44 = vpop.f32.mrb[0].mxu0 }
 0x28e   :  { %v5699_v45 = vadd.f32 %v4802_v44, %v192_v43  ;;  %v265_v46 = vpop.f32.mrb[1].mxu0 }
 0x28f   :  { %v5701_v47 = vadd.f32 %v265_v46, %v192_v43 }
 0x291   :  { %442 = vrot.lane.b32.xlu1 %v5701_v47, %s5451_s2  ;;  %276 = vrot.lane.b32.xlu0 %v5701_v47, %s5452_s20 }
 0x295   :  { %440 = vrot.lane.b32.xlu1 %v5701_v47, %s5453_s25 }
 0x303   :  { %v277_v48 = vpop.permute.xlu0 %276  ;;  %v443_v49 = vpop.permute.xlu1 %442 }
 0x304   :  { %4804 = vmatpush3.xpose.msk.msra.mxu0 %vm278_vm2, %v277_v48 }
 0x305   :  { %4813 = vmatprep.subr.mxu0 %v5449_v41 }
 0x307   :  { %4806 = vmatmul.mubr.msk.f32.vlgmr.msra.gmra.mrb[2].mxu0 %vm278_vm2, %v5701_v47  ;;  %v441_v50 = vpop.permute.xlu1 %440 }
 0x308   :  { %4814 = vmatpush3.xpose.msk.msra.mxu0 %vm278_vm2, %v443_v49  ;;  %4815 = vmatprep.mubr.msk.f32.mxu0 %vm5450_vm1, %v5449_v41 }
 0x309   :  { %4823 = vmatprep.subr.mxu0 %v5449_v41 }
 0x30b   :  { %4816 = vmatmul.mubr.msk.f32.vlgmr.msra.gmra.mrb[4].mxu0 %vm278_vm2, %v441_v50 }
 0x30c   :  { %4825 = vmatprep.mubr.msk.f32.mxu0 %vm5450_vm1, %v5449_v41  ;;  %4824 = vmatpush3.msra.mxu0 %v5740_v9 }
 0x30d   :  { %4833 = vmatprep.subr.mxu0 %v5449_v41 }
 0x3da   :  { %v349_v52 = vpop.f32.mrb[2].mxu0 }
 0x3db   :  { %v350_v53 = vadd.f32 %v349_v52, %v5720_v51  ;;  %v4807_v54 = vpop.f32.mrb[3].mxu0  ;;  %v5794_v52 = vld [vmem:[%s6250_s5 + $0x10] sm:$0xff] }
 0x3dd   :  { %v353_v55 = vsel %vm278_vm2, %v350_v53, -inf }
 0x3de   :  { %354 = vmax.xlane.f32.xlu1 %v353_v55  ;;  %v514_v56 = vpop.f32.mrb[4].mxu0 }
 0x3df   :  { %v515_v57 = vadd.f32 %v514_v56, %v5720_v51  ;;  %v4817_v58 = vpop.f32.mrb[5].mxu0 }
 0x3e1   :  { %v518_v59 = vsel %vm278_vm2, %v515_v57, -inf }
 0x3e2   :  { %519 = vmax.xlane.f32.xlu0 %v518_v59 }
 0x3ef   :  { %364 = vrot.lane.b32.xlu1 %v5701_v47, %s5454_s3 }
 0x3f3   :  { %753 = vrot.lane.b32.xlu1 %v5701_v47, %s5455_s24 }
 0x3f7   :  { %751 = vrot.lane.b32.xlu1 %v5701_v47, %s5456_s26 }
 0x46b   :  { %v355_v60 = vpop.xlane.xlu1 %354 }
 0x46c   :  { %v356_v61 = vsub.f32 %v350_v53, %v355_v60 }
 0x46e   :  { %v357_v62 = vmul.f32 1.442695, %v356_v61 }
 0x46f   :  { %v365_v63 = vpop.permute.xlu1 %364  ;;  %v520_v2 = vpop.xlane.xlu0 %519 }
 0x470   :  { %5180 = vpow2.f32 %v357_v62  ;;  %v521_v3 = vsub.f32 %v515_v57, %v520_v2  ;;  %4809 = vmatpush3.msra.mxu1 %v365_v63 }
 0x471   :  { %4818 = vmatprep.subr.mxu1 %v5449_v41 }
 0x472   :  { %v522_v4 = vmul.f32 1.442695, %v521_v3 }
 0x473   :  { %v754_v20 = vpop.permute.xlu1 %753 }
 0x474   :  { %5182 = vpow2.f32 %v522_v4 }
 0x477   :  { %v752_v23 = vpop.permute.xlu1 %751 }
 0x47a   :  { %v5181_v5 = vpop.eup %5180 }
 0x47b   :  { %v359_v6 = vsel %vm278_vm2, %v5181_v5, 0.0 }
 0x47c   :  { %360 = vadd.xlane.f32.xlu0 %v359_v6 }
 0x47e   :  { %v5183_v7 = vpop.eup %5182 }
 0x47f   :  { %v524_v8 = vsel %vm278_vm2, %v5183_v7, 0.0 }
 0x480   :  { %525 = vadd.xlane.f32.xlu0 %v524_v8 }
 0x496   :  { %529 = vrot.lane.b32.xlu0 %v5701_v47, %s5457_s27 }
 0x509   :  { %v361_v10 = vpop.xlane.xlu0 %360 }
 0x50a   :  { %5184 = vrcp.f32 %v361_v10 }
 0x50d   :  { %v526_v11 = vpop.xlane.xlu0 %525 }
 0x50e   :  { %5186 = vrcp.f32 %v526_v11  ;;  %v5831_v11 = vld [vmem:[%s6250_s5 + $0x18] sm:$0xff] }
 0x511   :  { %v530_v14 = vpop.permute.xlu0 %529 }
 0x514   :  { %v5185_v12 = vpop.eup %5184 }
 0x515   :  { %v363_v13 = vmul.f32 %v5185_v12, %v5181_v5 }
 0x517   :  { %4811 = vmatmul.mubr.msk.f32.vlgmr.msra.gmra.mrb[0].mxu1 %vm278_vm2, %v363_v13 }
 0x518   :  { %v5187_v15 = vpop.eup %5186  ;;  %4819 = vmatpush3.msra.mxu1 %v530_v14  ;;  %4820 = vmatprep.mubr.msk.f32.mxu1 %vm5450_vm1, %v5449_v41  ;;  %v5836_v14 = vld [vmem:[#allocation7 + $0x8] sm:$0xff] }
 0x519   :  { %v528_v16 = vmul.f32 %v5187_v15, %v5183_v7  ;;  %4828 = vmatprep.subr.mxu1 %v5449_v41 }
 0x51b   :  { %4821 = vmatmul.mubr.msk.f32.vlgmr.msra.gmra.mrb[2].mxu1 %vm278_vm2, %v528_v16 }
 0x51c   :  { %4830 = vmatprep.mubr.msk.f32.mxu1 %vm5450_vm1, %v5449_v41  ;;  %4829 = vmatpush3.msra.mxu1 %v5754_v17 }
 0x51d   :  { %4838 = vmatprep.subr.mxu1 %v5449_v41 }
 0x5ea   :  { %v436_v18 = vpop.f32.mrb[0].mxu1 }
 0x5eb   :  { %v4812_v19 = vpop.f32.mrb[1].mxu1  ;;  %4831 = vmatmul.mubr.msk.f32.vlgmr.msra.gmra.mrb[4].mxu1 %vm278_vm2, %v436_v18 }
 0x5ec   :  { %4840 = vmatprep.mubr.msk.f32.mxu1 %vm5450_vm1, %v5449_v41 }
 0x5ee   :  { %v601_v21 = vpop.f32.mrb[2].mxu1 }
 0x5ef   :  { %v4822_v22 = vpop.f32.mrb[3].mxu1  ;;  %4826 = vmatmul.mubr.msk.f32.vlgmr.msra.gmra.mrb[6].mxu0 %vm278_vm2, %v601_v21 }
 0x5f0   :  { %4834 = vmatpush3.xpose.msk.msra.mxu0 %vm278_vm2, %v754_v20  ;;  %4835 = vmatprep.mubr.msk.f32.mxu0 %vm5450_vm1, %v5449_v41 }
 0x5f1   :  { %4843 = vmatprep.subr.mxu0 %v5449_v41 }
 0x5f3   :  { %4836 = vmatmul.mubr.msk.f32.vlgmr.msra.gmra.mrb[8].mxu0 %vm278_vm2, %v752_v23 }
 0x5f4   :  { %4845 = vmatprep.mubr.msk.f32.mxu0 %vm5450_vm1, %v5449_v41  ;;  %4844 = vmatpush3.msra.mxu0 %v5794_v52 }
 0x5f5   :  { %4853 = vmatprep.subr.mxu0 %v5449_v41 }
 0x6be   :  { %v747_v24 = vpop.f32.mrb[4].mxu1 }
 0x6bf   :  { %v4832_v25 = vpop.f32.mrb[5].mxu1 }
 0x6c2   :  { %v674_v27 = vpop.f32.mrb[6].mxu0 }
 0x6c3   :  { %v5769_v28 = vadd.f32 %v747_v24, %v674_v27  ;;  %v4827_v31 = vpop.f32.mrb[7].mxu0 }
 0x6c6   :  { %v825_v32 = vpop.f32.mrb[8].mxu0 }
 0x6c7   :  { %v826_v33 = vadd.f32 %v825_v32, %v5720_v51  ;;  %v4837_v34 = vpop.f32.mrb[9].mxu0 }
 0x6c9   :  { %v829_v35 = vsel %vm278_vm2, %v826_v33, -inf }
 0x6ca   :  { %830 = vmax.xlane.f32.xlu1 %v829_v35 }
 0x6db   :  { %992 = vrot.lane.b32.xlu1 %v5701_v47, %s5458_s22 }
 0x6df   :  { %990 = vrot.lane.b32.xlu1 %v5701_v47, %s5459_s7 }
 0x6e3   :  { %1232 = vrot.lane.b32.xlu1 %v5699_v45, %s5452_s20 }
 0x757   :  { %v831_v36 = vpop.xlane.xlu1 %830 }
 0x758   :  { %v832_v37 = vsub.f32 %v826_v33, %v831_v36 }
 0x75a   :  { %v833_v38 = vmul.f32 1.442695, %v832_v37 }
 0x75b   :  { %v993_v48 = vpop.permute.xlu1 %992 }
 0x75c   :  { %5188 = vpow2.f32 %v833_v38 }
 0x75f   :  { %v991_v50 = vpop.permute.xlu1 %990 }
 0x763   :  { %v1233_v4 = vpop.permute.xlu1 %1232 }
 0x766   :  { %v5189_v39 = vpop.eup %5188 }
 0x767   :  { %v835_v40 = vsel %vm278_vm2, %v5189_v39, 0.0 }
 0x768   :  { %836 = vadd.xlane.f32.xlu0 %v835_v40 }
 0x77e   :  { %840 = vrot.lane.b32.xlu0 %v5701_v47, %s5460_s23 }
 0x7f5   :  { %v837_v43 = vpop.xlane.xlu0 %836 }
 0x7f6   :  { %5190 = vrcp.f32 %v837_v43 }
 0x7f9   :  { %v841_v44 = vpop.permute.xlu0 %840 }
 0x7fa   :  { %4839 = vmatpush3.msra.mxu1 %v841_v44 }
 0x7fb   :  { %4848 = vmatprep.subr.mxu1 %v5449_v41 }
 0x800   :  { %v5191_v46 = vpop.eup %5190 }
 0x801   :  { %v839_v49 = vmul.f32 %v5191_v46, %v5189_v39 }
 0x803   :  { %4841 = vmatmul.mubr.msk.f32.vlgmr.msra.gmra.mrb[6].mxu1 %vm278_vm2, %v839_v49 }
 0x804   :  { %4849 = vmatpush3.xpose.msk.msra.mxu1 %vm278_vm2, %v993_v48  ;;  %4850 = vmatprep.mubr.msk.f32.mxu1 %vm5450_vm1, %v5449_v41 }
 0x805   :  { %4858 = vmatprep.subr.mxu1 %v5449_v41 }
 0x807   :  { %4851 = vmatmul.mubr.msk.f32.vlgmr.msra.gmra.mrb[8].mxu1 %vm278_vm2, %v991_v50 }
 0x808   :  { %4860 = vmatprep.mubr.msk.f32.mxu1 %vm5450_vm1, %v5449_v41  ;;  %4859 = vmatpush3.msra.mxu1 %v5831_v11 }
 0x809   :  { %4868 = vmatprep.subr.mxu1 %v5449_v41 }
 0x8d6   :  { %v912_v53 = vpop.f32.mrb[6].mxu1 }
 0x8d7   :  { %v4842_v54 = vpop.f32.mrb[7].mxu1  ;;  %4846 = vmatmul.mubr.msk.f32.vlgmr.msra.gmra.mrb[10].mxu0 %vm278_vm2, %v912_v53 }
 0x8d8   :  { %4855 = vmatprep.mubr.msk.f32.mxu0 %vm5450_vm1, %v5449_v41 }
 0x8da   :  { %v1064_v55 = vpop.f32.mrb[8].mxu1 }
 0x8db   :  { %v1065_v56 = vadd.f32 %v1064_v55, %v5720_v51  ;;  %v4852_v57 = vpop.f32.mrb[9].mxu1 }
 0x8dd   :  { %v1068_v58 = vsel %vm278_vm2, %v1065_v56, -inf }
 0x8de   :  { %1069 = vmax.xlane.f32.xlu0 %v1068_v58 }
 0x8f4   :  { %1079 = vrot.lane.b32.xlu0 %v5701_v47, %s5461_s13 }
 0x8f8   :  { %1397 = vrot.lane.b32.xlu0 %v5699_v45, %s5451_s2 }
 0x96b   :  { %v1070_v59 = vpop.xlane.xlu0 %1069 }
 0x96c   :  { %v1071_v60 = vsub.f32 %v1065_v56, %v1070_v59 }
 0x96e   :  { %v1072_v61 = vmul.f32 1.442695, %v1071_v60 }
 0x96f   :  { %v1080_v62 = vpop.permute.xlu0 %1079 }
 0x970   :  { %5192 = vpow2.f32 %v1072_v61  ;;  %4854 = vmatpush3.msra.mxu0 %v1080_v62 }
 0x971   :  { %4863 = vmatprep.subr.mxu0 %v5449_v41 }
 0x973   :  { %v1398_v8 = vpop.permute.xlu0 %1397 }
 0x97a   :  { %v5193_v51 = vpop.eup %5192 }
 0x97b   :  { %v1074_v63 = vsel %vm278_vm2, %v5193_v51, 0.0 }
 0x97c   :  { %1075 = vadd.xlane.f32.xlu1 %v1074_v63 }
 0x98d   :  { %1395 = vrot.lane.b32.xlu1 %v5699_v45, %s5453_s25 }
 0x9aa   :  { %v985_v2 = vpop.f32.mrb[10].mxu0 }
 0x9ab   :  { %v989_v47 = vadd.f32 %v985_v2, %v5769_v28  ;;  %v4847_v3 = vpop.f32.mrb[11].mxu0 }
 0xa09   :  { %v1076_v5 = vpop.xlane.xlu1 %1075 }
 0xa0a   :  { %5194 = vrcp.f32 %v1076_v5 }
 0xa0d   :  { %v1396_v10 = vpop.permute.xlu1 %1395 }
 0xa14   :  { %v5195_v6 = vpop.eup %5194 }
 0xa15   :  { %v1078_v7 = vmul.f32 %v5195_v6, %v5193_v51 }
 0xa17   :  { %4856 = vmatmul.mubr.msk.f32.vlgmr.msra.gmra.mrb[12].mxu0 %vm278_vm2, %v1078_v7 }
 0xa18   :  { %4864 = vmatpush3.xpose.msk.msra.mxu0 %vm278_vm2, %v1233_v4  ;;  %4865 = vmatprep.mubr.msk.f32.mxu0 %vm5450_vm1, %v5449_v41 }
 0xa19   :  { %4873 = vmatprep.subr.mxu0 %v5449_v41 }
 0xa1b   :  { %4866 = vmatmul.mubr.msk.f32.vlgmr.msra.gmra.mrb[14].mxu0 %vm278_vm2, %v5699_v45 }
 0xa1c   :  { %4874 = vmatpush3.xpose.msk.msra.mxu0 %vm278_vm2, %v1398_v8  ;;  %4875 = vmatprep.mubr.msk.f32.mxu0 %vm5450_vm1, %v5449_v41 }
 0xa1d   :  { %4883 = vmatprep.subr.mxu0 %v5449_v41 }
 0xa1f   :  { %4876 = vmatmul.mubr.msk.f32.vlgmr.msra.gmra.mrb[16].mxu0 %vm278_vm2, %v1396_v10 }
 0xa20   :  { %4884 = vmatpush3.msra.mxu0 %v5740_v9  ;;  %4885 = vmatprep.mubr.msk.f32.mxu0 %vm5450_vm1, %v5449_v41 }
 0xa21   :  { %4893 = vmatprep.subr.mxu0 %v5449_v41 }
 0xaea   :  { %v1151_v12 = vpop.f32.mrb[12].mxu0 }
 0xaeb   :  { %v4857_v13 = vpop.f32.mrb[13].mxu0  ;;  %4861 = vmatmul.mubr.msk.f32.vlgmr.msra.gmra.mrb[10].mxu1 %vm278_vm2, %v1151_v12 }
 0xaec   :  { %4870 = vmatprep.mubr.msk.f32.mxu1 %vm5450_vm1, %v5449_v41 }
 0xaee   :  { %v1304_v9 = vpop.f32.mrb[14].mxu0 }
 0xaef   :  { %v1305_v15 = vadd.f32 %v1304_v9, %v5836_v14  ;;  %v4867_v16 = vpop.f32.mrb[15].mxu0 }
 0xaf1   :  { %v1308_v18 = vsel %vm278_vm2, %v1305_v15, -inf }
 0xaf2   :  { %1309 = vmax.xlane.f32.xlu0 %v1308_v18  ;;  %v1469_v19 = vpop.f32.mrb[16].mxu0 }
 0xaf3   :  { %v1470_v20 = vadd.f32 %v1469_v19, %v5836_v14  ;;  %v4877_v21 = vpop.f32.mrb[17].mxu0 }
 0xaf5   :  { %v1473_v22 = vsel %vm278_vm2, %v1470_v20, -inf }
 0xaf6   :  { %1474 = vmax.xlane.f32.xlu1 %v1473_v22 }
 0xb07   :  { %1484 = vrot.lane.b32.xlu1 %v5699_v45, %s5457_s27 }
 0xb0b   :  { %1708 = vrot.lane.b32.xlu1 %v5699_v45, %s5455_s24 }
 0xb0f   :  { %1706 = vrot.lane.b32.xlu1 %v5699_v45, %s5456_s26 }
 0xb7f   :  { %v1310_v23 = vpop.xlane.xlu0 %1309 }
 0xb80   :  { %v1311_v24 = vsub.f32 %v1305_v15, %v1310_v23  ;;  %v2186_v15 = vsub.s32 2, %v5675_v26 }
 0xb82   :  { %v1312_v25 = vmul.f32 1.442695, %v1311_v24  ;;  %v2187_v16 = vrot.slane %v5696_v42, %v2186_v15 }
 0xb83   :  { %v1475_v27 = vpop.xlane.xlu1 %1474 }
 0xb84   :  { %5196 = vpow2.f32 %v1312_v25  ;;  %v1476_v28 = vsub.f32 %v1470_v20, %v1475_v27 }
 0xb86   :  { %v1477_v31 = vmul.f32 1.442695, %v1476_v28 }
 0xb87   :  { %v1485_v48 = vpop.permute.xlu1 %1484 }
 0xb88   :  { %5198 = vpow2.f32 %v1477_v31 }
 0xb8b   :  { %v1709_v55 = vpop.permute.xlu1 %1708 }
 0xb8e   :  { %v5197_v32 = vpop.eup %5196 }
 0xb8f   :  { %v1314_v33 = vsel %vm278_vm2, %v5197_v32, 0.0 }
 0xb90   :  { %1315 = vadd.xlane.f32.xlu0 %v1314_v33 }
 0xb92   :  { %v5199_v34 = vpop.eup %5198 }
 0xb93   :  { %v1479_v35 = vsel %vm278_vm2, %v5199_v34, 0.0 }
 0xb94   :  { %1480 = vadd.xlane.f32.xlu0 %v1479_v35 }
 0xbaa   :  { %1319 = vrot.lane.b32.xlu0 %v5699_v45, %s5454_s3 }
 0xbbe   :  { %v1224_v36 = vpop.f32.mrb[10].mxu1 }
 0xbbf   :  { %v5854_v37 = vadd.f32 %v1224_v36, %v989_v47  ;;  %v4862_v38 = vpop.f32.mrb[11].mxu1 }
 0xbc1   :  { %v2188_v20 = vadd.f32 %v2187_v16, %v5854_v37 }
 0xbc3   :  { %v5908_v23 = vadd.f32 %v2188_v20, %v5651_v0 }
 0xbc5   :  { %v2192_v25 = vsel %vm141_vm0, %v5908_v23, 0.0 }
 0xc1d   :  { %v1316_v39 = vpop.xlane.xlu0 %1315 }
 0xc1e   :  { %5200 = vrcp.f32 %v1316_v39 }
 0xc21   :  { %v1481_v40 = vpop.xlane.xlu0 %1480 }
 0xc22   :  { %5202 = vrcp.f32 %v1481_v40 }
 0xc25   :  { %v1320_v43 = vpop.permute.xlu0 %1319 }
 0xc26   :  { %4869 = vmatpush3.msra.mxu1 %v1320_v43 }
 0xc27   :  { %4878 = vmatprep.subr.mxu1 %v5449_v41 }
 0xc28   :  { %v5201_v44 = vpop.eup %5200 }
 0xc29   :  { %v1318_v46 = vmul.f32 %v5201_v44, %v5197_v32 }
 0xc2b   :  { %4871 = vmatmul.mubr.msk.f32.vlgmr.msra.gmra.mrb[12].mxu1 %vm278_vm2, %v1318_v46 }
 0xc2c   :  { %v5203_v49 = vpop.eup %5202  ;;  %4879 = vmatpush3.msra.mxu1 %v1485_v48  ;;  %4880 = vmatprep.mubr.msk.f32.mxu1 %vm5450_vm1, %v5449_v41 }
 0xc2d   :  { %v1483_v50 = vmul.f32 %v5203_v49, %v5199_v34  ;;  %4888 = vmatprep.subr.mxu1 %v5449_v41 }
 0xc2f   :  { %4881 = vmatmul.mubr.msk.f32.vlgmr.msra.gmra.mrb[14].mxu1 %vm278_vm2, %v1483_v50 }
 0xc30   :  { %4889 = vmatpush3.msra.mxu1 %v5754_v17  ;;  %4890 = vmatprep.mubr.msk.f32.mxu1 %vm5450_vm1, %v5449_v41  ;;  %v1707_v17 = vpop.permute.xlu1 %1706 }
 0xc31   :  { %4898 = vmatprep.subr.mxu1 %v5449_v41 }
 0xcfe   :  { %v1391_v53 = vpop.f32.mrb[12].mxu1 }
 0xcff   :  { %v4872_v54 = vpop.f32.mrb[13].mxu1  ;;  %4891 = vmatmul.mubr.msk.f32.vlgmr.msra.gmra.mrb[16].mxu1 %vm278_vm2, %v1391_v53 }
 0xd00   :  { %4900 = vmatprep.mubr.msk.f32.mxu1 %vm5450_vm1, %v5449_v41 }
 0xd02   :  { %v1556_v56 = vpop.f32.mrb[14].mxu1 }
 0xd03   :  { %v4882_v57 = vpop.f32.mrb[15].mxu1  ;;  %4886 = vmatmul.mubr.msk.f32.vlgmr.msra.gmra.mrb[18].mxu0 %vm278_vm2, %v1556_v56 }
 0xd04   :  { %4894 = vmatpush3.xpose.msk.msra.mxu0 %vm278_vm2, %v1709_v55  ;;  %4895 = vmatprep.mubr.msk.f32.mxu0 %vm5450_vm1, %v5449_v41  ;;  %v2232_v57 = vld [vmem:[%s6251_s6 + $0x10] sm:$0xff] }
 0xd05   :  { %4903 = vmatprep.subr.mxu0 %v5449_v41 }
 0xd07   :  { %4896 = vmatmul.mubr.msk.f32.vlgmr.msra.gmra.mrb[20].mxu0 %vm278_vm2, %v1707_v17  ;;  %v2233_v17 = vld [vmem:[%s6251_s6 + $0x18] sm:$0xff] }
 0xd08   :  { %4904 = vmatpush3.msra.mxu0 %v5794_v52  ;;  %4905 = vmatprep.mubr.msk.f32.mxu0 %vm5450_vm1, %v5449_v41 }
 0xd09   :  { %4913 = vmatprep.subr.mxu0 %v5449_v41 }
 0xdd2   :  { %v1702_v58 = vpop.f32.mrb[16].mxu1 }
 0xdd3   :  { %v4892_v59 = vpop.f32.mrb[17].mxu1 }
 0xdd6   :  { %v1629_v60 = vpop.f32.mrb[18].mxu0 }
 0xdd7   :  { %v1703_v61 = vadd.f32 %v1702_v58, %v1629_v60  ;;  %v4887_v62 = vpop.f32.mrb[19].mxu0  ;;  %v5171_v58 = vpack.i.bf16 %v2233_v17, %v2232_v57 }
 0xdda   :  { %v1780_v51 = vpop.f32.mrb[20].mxu0 }
 0xddb   :  { %v1781_v63 = vadd.f32 %v1780_v51, %v5836_v14  ;;  %v4897_v2 = vpop.f32.mrb[21].mxu0 }
 0xddd   :  { %v1784_v47 = vsel %vm278_vm2, %v1781_v63, -inf }
 0xdde   :  { %1785 = vmax.xlane.f32.xlu0 %v1784_v47  ;;  %v2226_v47 = vsub.s32 3, %v5675_v26 }
 0xdf4   :  { %1795 = vrot.lane.b32.xlu0 %v5699_v45, %s5460_s23 }
 0xdf8   :  { %1945 = vrot.lane.b32.xlu0 %v5699_v45, %s5459_s7 }
 0xe6b   :  { %v1786_v52 = vpop.xlane.xlu0 %1785 }
 0xe6c   :  { %v1787_v3 = vsub.f32 %v1781_v63, %v1786_v52  ;;  %v2221_v52 = vrot.slane %v5681_v29, %v2186_v15  ;;  %v5107_v15 = vpack.c.bf16 %v2233_v17, %v2232_v57 }
 0xe6e   :  { %v1788_v4 = vmul.f32 1.442695, %v1787_v3  ;;  %v2230_v3 = vld [vmem:[%s6251_s6] sm:$0xff] }
 0xe6f   :  { %v1796_v5 = vpop.permute.xlu0 %1795 }
 0xe70   :  { %5204 = vpow2.f32 %v1788_v4  ;;  %4899 = vmatpush3.msra.mxu1 %v1796_v5  ;;  %v2231_v4 = vld [vmem:[%s6251_s6 + $0x8] sm:$0xff] }
 0xe71   :  { %4908 = vmatprep.subr.mxu1 %v5449_v41 }
 0xe73   :  { %v1946_v9 = vpop.permute.xlu0 %1945 }
 0xe7a   :  { %v5205_v6 = vpop.eup %5204 }
 0xe7b   :  { %v1790_v7 = vsel %vm278_vm2, %v5205_v6, 0.0 }
 0xe7c   :  { %1791 = vadd.xlane.f32.xlu1 %v1790_v7  ;;  %v2227_v7 = vrot.slane %v5681_v29, %v2226_v47  ;;  %v5954_v29 = vrot.slane %v5696_v42, %v177_v30  ;;  %v138_v30 = vld [vmem:[#allocation5 + $0x8] sm:$0xff] }
 0xe8d   :  { %1947 = vrot.lane.b32.xlu1 %v5699_v45, %s5458_s22 }
 0xf09   :  { %v1792_v8 = vpop.xlane.xlu1 %1791 }
 0xf0a   :  { %5206 = vrcp.f32 %v1792_v8  ;;  %v5166_v8 = vpack.i.bf16 %v2231_v4, %v2230_v3 }
 0xf0d   :  { %v1948_v13 = vpop.permute.xlu1 %1947 }
 0xf14   :  { %v5207_v10 = vpop.eup %5206 }
 0xf15   :  { %v1794_v12 = vmul.f32 %v5207_v10, %v5205_v6 }
 0xf17   :  { %4901 = vmatmul.mubr.msk.f32.vlgmr.msra.gmra.mrb[18].mxu1 %vm278_vm2, %v1794_v12 }
 0xf18   :  { %4909 = vmatpush3.xpose.msk.msra.mxu1 %vm278_vm2, %v1948_v13  ;;  %4910 = vmatprep.mubr.msk.f32.mxu1 %vm5450_vm1, %v5449_v41  ;;  %v5103_v13 = vpack.c.bf16 %v2231_v4, %v2230_v3  ;;  %v6013_v4 = vld [vmem:[#allocation10 + $0x8] sm:$0xff] }
 0xf19   :  { %4918 = vmatprep.subr.mxu1 %v5449_v41 }
 0xf1b   :  { %4911 = vmatmul.mubr.msk.f32.vlgmr.msra.gmra.mrb[20].mxu1 %vm278_vm2, %v1946_v9  ;;  %v137_v9 = vld [vmem:[#allocation5] sm:$0xff] }
 0xf1c   :  { %4919 = vmatpush3.msra.mxu1 %v5831_v11  ;;  %4920 = vmatprep.mubr.msk.f32.mxu1 %vm5450_vm1, %v5449_v41 }
 0xfea   :  { %v1867_v18 = vpop.f32.mrb[18].mxu1 }
 0xfeb   :  { %v4902_v19 = vpop.f32.mrb[19].mxu1  ;;  %4906 = vmatmul.mubr.msk.f32.vlgmr.msra.gmra.mrb[22].mxu0 %vm278_vm2, %v1867_v18 }
 0xfec   :  { %4915 = vmatprep.mubr.msk.f32.mxu0 %vm5450_vm1, %v5449_v41 }
 0xfee   :  { %v2019_v21 = vpop.f32.mrb[20].mxu1 }
 0xfef   :  { %v2020_v11 = vadd.f32 %v2019_v21, %v5836_v14  ;;  %v4912_v22 = vpop.f32.mrb[21].mxu1 }
 0xff1   :  { %v2023_v24 = vsel %vm278_vm2, %v2020_v11, -inf }
 0xff2   :  { %2024 = vmax.xlane.f32.xlu1 %v2023_v24 }
 0xff6   :  { %2193 = vadd.xlane.f32.xlu1 %v2192_v25 }
0x107f   :  { %v2025_v27 = vpop.xlane.xlu1 %2024 }
0x1080   :  { %v2026_v28 = vsub.f32 %v2020_v11, %v2025_v27 }
0x1082   :  { %v2027_v31 = vmul.f32 1.442695, %v2026_v28 }
0x1083   :  { %v2194_v43 = vpop.xlane.xlu1 %2193 }
0x1084   :  { %5208 = vpow2.f32 %v2027_v31  ;;  %v2198_v44 = vmul.f32 0.03125, %v2194_v43  ;;  %v5993_v43 = vld [vmem:[#allocation8] sm:$0xff] }
0x1086   :  { %v2200_v49 = vsub.f32 %v5908_v23, %v2198_v44 }
0x1088   :  { %v2202_v55 = vmul.f32 %v2200_v49, %v2200_v49 }
0x108a   :  { %v2204_v56 = vsel %vm141_vm0, %v2202_v55, 0.0 }
0x108e   :  { %v5209_v32 = vpop.eup %5208 }
0x108f   :  { %v2029_v33 = vsel %vm278_vm2, %v5209_v32, 0.0 }
0x1090   :  { %2030 = vadd.xlane.f32.xlu0 %v2029_v33 }
0x10a6   :  { %2034 = vrot.lane.b32.xlu0 %v5699_v45, %s5461_s13 }
0x10aa   :  { %5172 = vrot.lane.b32.xlu0 %v5171_v58, %s5452_s20 }
0x10ae   :  { %2340 = vrot.lane.b32.xlu0 %v5954_v29, %s5452_s20 }
0x10be   :  { %v1940_v0 = vpop.f32.mrb[22].mxu0 }
0x10bf   :  { %v1944_v14 = vadd.f32 %v1940_v0, %v1703_v61  ;;  %v4907_v34 = vpop.f32.mrb[23].mxu0 }
0x111d   :  { %v2031_v35 = vpop.xlane.xlu0 %2030 }
0x111e   :  { %5210 = vrcp.f32 %v2031_v35 }
0x1121   :  { %v2035_v36 = vpop.permute.xlu0 %2034 }
0x1122   :  { %4914 = vmatpush3.msra.mxu0 %v2035_v36 }
0x1123   :  { %5104 = vmatprep.subr.bf16.mxu0 %v5103_v13 }
0x1125   :  { %v5173_v18 = vpop.permute.xlu0 %5172 }
0x1126   :  { %v5175_v21 = vunpack.i.h.bf16 %v5173_v18  ;;  %v5174_v11 = vunpack.i.l.bf16 %v5173_v18 }
0x1128   :  { %v5211_v37 = vpop.eup %5210  ;;  %v5115_v28 = vpack.c.bf16 %v5175_v21, %v5174_v11 }
0x1129   :  { %v2033_v38 = vmul.f32 %v5211_v37, %v5209_v32  ;;  %v5965_v0 = vpop.permute.xlu0 %2340 }
0x112b   :  { %4916 = vmatmul.mubr.msk.f32.vlgmr.msra.gmra.mrb[24].mxu0 %vm278_vm2, %v2033_v38 }
0x112c   :  { %5106 = vmatpush3.bf16.msra.mxu0 %v5103_v13 }
0x112d   :  { %5108 = vmatprep.subr.bf16.mxu0 %v5107_v15 }
0x1130   :  { %5110 = vmatpush3.bf16.msra.mxu0 %v5107_v15 }
0x1131   :  { %4945 = vmatprep.subr.mxu0 %v5449_v41 }
0x11fe   :  { %v2106_v39 = vpop.f32.mrb[24].mxu0 }
0x11ff   :  { %v4917_v40 = vpop.f32.mrb[25].mxu0  ;;  %4921 = vmatmul.mubr.msk.f32.vlgmr.msra.gmra.mrb[22].mxu1 %vm278_vm2, %v2106_v39 }
0x1200   :  { %4942 = vmatprep.mubr.msk.f32.mxu1 %vm141_vm0, %v137_v9 }
0x12d2   :  { %v2179_v46 = vpop.f32.mrb[22].mxu1 }
0x12d3   :  { %v2183_v48 = vadd.f32 %v2179_v46, %v1944_v14  ;;  %v4922_v45 = vpop.f32.mrb[23].mxu1 }
0x12d5   :  { %v2189_v50 = vadd.f32 %v2187_v16, %v2183_v48 }
0x12d7   :  { %v5920_v53 = vadd.f32 %v2189_v50, %v5653_v1 }
0x12d9   :  { %v2195_v54 = vsel %vm141_vm0, %v5920_v53, 0.0 }
0x12da   :  { %2196 = vadd.xlane.f32.xlu1 %v2195_v54 }
0x12de   :  { %2205 = vadd.xlane.f32.xlu1 %v2204_v56 }
0x1367   :  { %v2197_v1 = vpop.xlane.xlu1 %2196 }
0x1368   :  { %v2199_v59 = vmul.f32 0.03125, %v2197_v1 }
0x136a   :  { %v2201_v60 = vsub.f32 %v5920_v53, %v2199_v59 }
0x136b   :  { %v2206_v61 = vpop.xlane.xlu1 %2205 }
0x136c   :  { %v2210_v62 = vmul.f32 0.03125, %v2206_v61  ;;  %v2203_v51 = vmul.f32 %v2201_v60, %v2201_v60 }
0x136e   :  { %v2212_v63 = vadd.f32 1e-05, %v2210_v62  ;;  %v2207_v2 = vsel %vm141_vm0, %v2203_v51, 0.0 }
0x136f   :  { %2208 = vadd.xlane.f32.xlu1 %v2207_v2 }
0x1370   :  { %5212 = vrsqrt.f32 %v2212_v63 }
0x137a   :  { %v5213_v5 = vpop.eup %5212 }
0x137b   :  { %v2216_v6 = vmul.f32 %v5213_v5, %v2200_v49 }
0x137d   :  { %v2222_v10 = vmul.f32 %v2221_v52, %v2216_v6 }
0x137f   :  { %v2228_v12 = vadd.f32 %v2227_v7, %v2222_v10  ;;  %v6018_v10 = vld [vmem:[#allocation10] sm:$0xff] }
0x1380   :  { %5167 = vrot.lane.b32.xlu1 %v5166_v8, %s5452_s20 }
0x1381   :  { %4931 = vmatprep.mubr.msk.f32.mxu0 %vm141_vm0, %v2228_v12 }
0x13fc   :  { %v2209_v16 = vpop.xlane.xlu1 %2208 }
0x13fd   :  { %v2211_v19 = vmul.f32 0.03125, %v2209_v16 }
0x13ff   :  { %v2213_v20 = vadd.f32 1e-05, %v2211_v19 }
0x1400   :  { %v5168_v22 = vpop.permute.xlu1 %5167 }
0x1401   :  { %5214 = vrsqrt.f32 %v2213_v20  ;;  %v5170_v24 = vunpack.i.h.bf16 %v5168_v22  ;;  %v5169_v25 = vunpack.i.l.bf16 %v5168_v22 }
0x1403   :  { %v5111_v27 = vpack.c.bf16 %v5170_v24, %v5169_v25 }
0x1405   :  { %5112 = vmatprep.subr.bf16.mxu1 %v5111_v27 }
0x1406   :  { %5114 = vmatpush3.bf16.msra.mxu1 %v5111_v27 }
0x1407   :  { %5116 = vmatprep.subr.bf16.mxu1 %v5115_v28 }
0x140a   :  { %5118 = vmatpush3.bf16.msra.mxu1 %v5115_v28 }
0x140b   :  { %v5215_v42 = vpop.eup %5214  ;;  %4950 = vmatprep.subr.mxu1 %v5449_v41 }
0x140c   :  { %v2217_v31 = vmul.f32 %v5215_v42, %v2201_v60 }
0x140d   :  { %4943 = vmatmul.mubr.msk.f32.vlgmr.msra.gmra.mrb[24].mxu1 %vm141_vm0, %v138_v30 }
0x140e   :  { %v2223_v32 = vmul.f32 %v2221_v52, %v2217_v31  ;;  %4952 = vmatprep.mubr.msk.f32.mxu1 %vm5450_vm1, %v5449_v41 }
0x1410   :  { %v2229_v33 = vadd.f32 %v2227_v7, %v2223_v32 }
0x1412   :  { %4932 = vmatmul.mubr.msk.f32.vlgmr.msra.gmra.mrb[26].mxu0 %vm141_vm0, %v2229_v33 }
0x1413   :  { %4947 = vmatprep.mubr.msk.f32.mxu0 %vm5450_vm1, %v5449_v41 }
0x14e0   :  { %v5967_v14 = vpop.f32.mrb[24].mxu1 }
0x14e1   :  { %v2415_v34 = vpop.f32.mrb[25].mxu1 }
0x14e2   :  { %v5970_v35 = vadd.f32 %v2415_v34, %v5965_v0 }
0x14e4   :  { %2590 = vrot.lane.b32.xlu0 %v5970_v35, %s5453_s25  ;;  %4946 = vmatpush3.xpose.msk.msra.mxu0 %vm278_vm2, %v5970_v35 }
0x14e5   :  { %v5976_v36 = vpop.f32.mrb[26].mxu0  ;;  %4955 = vmatprep.subr.mxu0 %v5449_v41 }
0x14e6   :  { %v2314_v37 = vpop.f32.mrb[27].mxu0 }
0x14e7   :  { %v5980_v38 = vadd.f32 %v2314_v37, %v5954_v29 }
0x14e9   :  { %2588 = vrot.lane.b32.xlu0 %v5980_v38, %s5453_s25  ;;  %4948 = vmatmul.mubr.msk.f32.vlgmr.msra.gmra.mrb[28].mxu0 %vm278_vm2, %v5980_v38 }
0x14ea   :  { %4957 = vmatprep.mubr.msk.f32.mxu0 %vm5450_vm1, %v5449_v41 }
0x1556   :  { %v2591_v39 = vpop.permute.xlu0 %2590 }
0x1557   :  { %4956 = vmatpush3.xpose.msk.msra.mxu0 %vm278_vm2, %v2591_v39 }
0x1558   :  { %4965 = vmatprep.subr.mxu0 %v5449_v41 }
0x155b   :  { %v2589_v40 = vpop.permute.xlu0 %2588 }
0x155c   :  { %4958 = vmatmul.mubr.msk.f32.vlgmr.msra.gmra.mrb[30].mxu0 %vm278_vm2, %v2589_v40 }
0x155d   :  { %4967 = vmatprep.mubr.msk.f32.mxu0 %vm5450_vm1, %v5449_v41  ;;  %4966 = vmatpush3.msra.mxu0 %v6013_v4 }
0x155e   :  { %4975 = vmatprep.subr.mxu0 %v5449_v41 }
0x15bc   :  { %v2497_v44 = vpop.f32.mrb[28].mxu0 }
0x15bd   :  { %v2498_v46 = vadd.f32 %v2497_v44, %v5993_v43  ;;  %v4949_v48 = vpop.f32.mrb[29].mxu0 }
0x15bf   :  { %v2501_v45 = vsel %vm278_vm2, %v2498_v46, -inf }
0x15c0   :  { %2502 = vmax.xlane.f32.xlu1 %v2501_v45 }
0x15d1   :  { %2512 = vrot.lane.b32.xlu1 %v5970_v35, %s5452_s20 }
0x15d5   :  { %2901 = vrot.lane.b32.xlu1 %v5970_v35, %s5456_s26 }
0x15d9   :  { %2899 = vrot.lane.b32.xlu1 %v5980_v38, %s5456_s26 }
0x162f   :  { %v2662_v49 = vpop.f32.mrb[30].mxu0 }
0x1630   :  { %v2663_v50 = vadd.f32 %v2662_v49, %v5993_v43  ;;  %v4959_v54 = vpop.f32.mrb[31].mxu0 }
0x1632   :  { %v2666_v55 = vsel %vm278_vm2, %v2663_v50, -inf }
0x1633   :  { %2667 = vmax.xlane.f32.xlu0 %v2666_v55 }
0x164d   :  { %v2503_v56 = vpop.xlane.xlu1 %2502 }
0x164e   :  { %v2504_v57 = vsub.f32 %v2498_v46, %v2503_v56  ;;  %v6054_v46 = vld [vmem:[#allocation10 + $0x10] sm:$0xff]  ;;  %v6067_v56 = vadd.f32 %v5976_v36, %v5954_v29 }
0x1650   :  { %v2505_v17 = vmul.f32 1.442695, %v2504_v57 }
0x1651   :  { %v2513_v58 = vpop.permute.xlu1 %2512 }
0x1652   :  { %5216 = vpow2.f32 %v2505_v17  ;;  %4951 = vmatpush3.msra.mxu1 %v2513_v58 }
0x1653   :  { %4960 = vmatprep.subr.mxu1 %v5449_v41 }
0x1655   :  { %v2902_v9 = vpop.permute.xlu1 %2901 }
0x1659   :  { %v2900_v18 = vpop.permute.xlu1 %2899 }
0x165c   :  { %v5217_v1 = vpop.eup %5216 }
0x165d   :  { %v2507_v59 = vsel %vm278_vm2, %v5217_v1, 0.0 }
0x165e   :  { %2508 = vadd.xlane.f32.xlu0 %v2507_v59 }
0x16c0   :  { %v2668_v60 = vpop.xlane.xlu0 %2667 }
0x16c1   :  { %v2669_v61 = vsub.f32 %v2663_v50, %v2668_v60 }
0x16c3   :  { %v2670_v62 = vmul.f32 1.442695, %v2669_v61 }
0x16c5   :  { %5218 = vpow2.f32 %v2670_v62 }
0x16cf   :  { %v5219_v51 = vpop.eup %5218 }
0x16d0   :  { %v2672_v63 = vsel %vm278_vm2, %v5219_v51, 0.0 }
0x16d1   :  { %2673 = vadd.xlane.f32.xlu0 %v2672_v63  ;;  %v6096_v63 = vld [vmem:[#allocation10 + $0x18] sm:$0xff] }
0x16e7   :  { %2677 = vrot.lane.b32.xlu0 %v5970_v35, %s5451_s2 }
0x16eb   :  { %v2509_v2 = vpop.xlane.xlu0 %2508 }
0x16ec   :  { %5220 = vrcp.f32 %v2509_v2 }
0x16f6   :  { %v5221_v52 = vpop.eup %5220 }
0x16f7   :  { %v2511_v3 = vmul.f32 %v5221_v52, %v5217_v1 }
0x16f9   :  { %4953 = vmatmul.mubr.msk.f32.vlgmr.msra.gmra.mrb[26].mxu1 %vm278_vm2, %v2511_v3  ;;  %v6101_v3 = vld [vmem:[#allocation8 + $0x8] sm:$0xff] }
0x16fa   :  { %4962 = vmatprep.mubr.msk.f32.mxu1 %vm5450_vm1, %v5449_v41 }
0x175e   :  { %v2674_v5 = vpop.xlane.xlu0 %2673 }
0x175f   :  { %5222 = vrcp.f32 %v2674_v5 }
0x1762   :  { %v2678_v6 = vpop.permute.xlu0 %2677 }
0x1763   :  { %4961 = vmatpush3.msra.mxu1 %v2678_v6 }
0x1764   :  { %4970 = vmatprep.subr.mxu1 %v5449_v41 }
0x1769   :  { %v5223_v7 = vpop.eup %5222 }
0x176a   :  { %v2676_v8 = vmul.f32 %v5223_v7, %v5219_v51 }
0x176c   :  { %4963 = vmatmul.mubr.msk.f32.vlgmr.msra.gmra.mrb[28].mxu1 %vm278_vm2, %v2676_v8 }
0x176d   :  { %4971 = vmatpush3.msra.mxu1 %v6018_v10  ;;  %4972 = vmatprep.mubr.msk.f32.mxu1 %vm5450_vm1, %v5449_v41 }
0x176e   :  { %4980 = vmatprep.subr.mxu1 %v5449_v41 }
0x17cc   :  { %v2584_v12 = vpop.f32.mrb[26].mxu1 }
0x17cd   :  { %v4954_v13 = vpop.f32.mrb[27].mxu1  ;;  %4973 = vmatmul.mubr.msk.f32.vlgmr.msra.gmra.mrb[30].mxu1 %vm278_vm2, %v2584_v12 }
0x17ce   :  { %4982 = vmatprep.mubr.msk.f32.mxu1 %vm5450_vm1, %v5449_v41 }
0x183f   :  { %v2749_v15 = vpop.f32.mrb[28].mxu1 }
0x1840   :  { %v4964_v16 = vpop.f32.mrb[29].mxu1  ;;  %4968 = vmatmul.mubr.msk.f32.vlgmr.msra.gmra.mrb[32].mxu0 %vm278_vm2, %v2749_v15 }
0x1841   :  { %4976 = vmatpush3.xpose.msk.msra.mxu0 %vm278_vm2, %v2902_v9  ;;  %4977 = vmatprep.mubr.msk.f32.mxu0 %vm5450_vm1, %v5449_v41 }
0x1842   :  { %4985 = vmatprep.subr.mxu0 %v5449_v41 }
0x1844   :  { %4978 = vmatmul.mubr.msk.f32.vlgmr.msra.gmra.mrb[34].mxu0 %vm278_vm2, %v2900_v18 }
0x1845   :  { %4987 = vmatprep.mubr.msk.f32.mxu0 %vm5450_vm1, %v5449_v41  ;;  %4986 = vmatpush3.msra.mxu0 %v6054_v46 }
0x1846   :  { %4995 = vmatprep.subr.mxu0 %v5449_v41 }
0x18a0   :  { %v2895_v19 = vpop.f32.mrb[30].mxu1 }
0x18a1   :  { %v4974_v20 = vpop.f32.mrb[31].mxu1 }
0x1913   :  { %v2822_v21 = vpop.f32.mrb[32].mxu0 }
0x1914   :  { %v2896_v11 = vadd.f32 %v2895_v19, %v2822_v21  ;;  %v4969_v22 = vpop.f32.mrb[33].mxu0 }
0x1917   :  { %v2973_v24 = vpop.f32.mrb[34].mxu0 }
0x1918   :  { %v2974_v25 = vadd.f32 %v2973_v24, %v5993_v43  ;;  %v4979_v27 = vpop.f32.mrb[35].mxu0 }
0x191a   :  { %v2977_v28 = vsel %vm278_vm2, %v2974_v25, -inf }
0x191b   :  { %2978 = vmax.xlane.f32.xlu1 %v2977_v28 }
0x192c   :  { %3140 = vrot.lane.b32.xlu1 %v5970_v35, %s5459_s7 }
0x1930   :  { %3138 = vrot.lane.b32.xlu1 %v5980_v38, %s5459_s7 }
0x19a8   :  { %v2979_v30 = vpop.xlane.xlu1 %2978 }
0x19a9   :  { %v2980_v42 = vsub.f32 %v2974_v25, %v2979_v30 }
0x19ab   :  { %v2981_v31 = vmul.f32 1.442695, %v2980_v42 }
0x19ac   :  { %v3141_v40 = vpop.permute.xlu1 %3140 }
0x19ad   :  { %5224 = vpow2.f32 %v2981_v31 }
0x19b0   :  { %v3139_v44 = vpop.permute.xlu1 %3138 }
0x19b7   :  { %v5225_v32 = vpop.eup %5224 }
0x19b8   :  { %v2983_v33 = vsel %vm278_vm2, %v5225_v32, 0.0 }
0x19b9   :  { %2984 = vadd.xlane.f32.xlu0 %v2983_v33 }
0x19cf   :  { %2988 = vrot.lane.b32.xlu0 %v5970_v35, %s5455_s24 }
0x1a46   :  { %v2985_v34 = vpop.xlane.xlu0 %2984 }
0x1a47   :  { %5226 = vrcp.f32 %v2985_v34 }
0x1a4a   :  { %v2989_v37 = vpop.permute.xlu0 %2988 }
0x1a4b   :  { %4981 = vmatpush3.msra.mxu1 %v2989_v37 }
0x1a4c   :  { %4990 = vmatprep.subr.mxu1 %v5449_v41 }
0x1a51   :  { %v5227_v39 = vpop.eup %5226 }
0x1a52   :  { %v2987_v38 = vmul.f32 %v5227_v39, %v5225_v32 }
0x1a54   :  { %4983 = vmatmul.mubr.msk.f32.vlgmr.msra.gmra.mrb[32].mxu1 %vm278_vm2, %v2987_v38 }
0x1a55   :  { %4991 = vmatpush3.xpose.msk.msra.mxu1 %vm278_vm2, %v3141_v40  ;;  %4992 = vmatprep.mubr.msk.f32.mxu1 %vm5450_vm1, %v5449_v41 }
0x1a56   :  { %5000 = vmatprep.subr.mxu1 %v5449_v41 }
0x1a58   :  { %4993 = vmatmul.mubr.msk.f32.vlgmr.msra.gmra.mrb[34].mxu1 %vm278_vm2, %v3139_v44 }
0x1a59   :  { %5002 = vmatprep.mubr.msk.f32.mxu1 %vm5450_vm1, %v5449_v41  ;;  %5001 = vmatpush3.msra.mxu1 %v6096_v63 }
0x1a5a   :  { %5010 = vmatprep.subr.mxu1 %v5449_v41 }
0x1b27   :  { %v3060_v48 = vpop.f32.mrb[32].mxu1 }
0x1b28   :  { %v4984_v45 = vpop.f32.mrb[33].mxu1  ;;  %4988 = vmatmul.mubr.msk.f32.vlgmr.msra.gmra.mrb[36].mxu0 %vm278_vm2, %v3060_v48 }
0x1b29   :  { %4997 = vmatprep.mubr.msk.f32.mxu0 %vm5450_vm1, %v5449_v41 }
0x1b2b   :  { %v3212_v49 = vpop.f32.mrb[34].mxu1 }
0x1b2c   :  { %v3213_v50 = vadd.f32 %v3212_v49, %v5993_v43  ;;  %v4994_v54 = vpop.f32.mrb[35].mxu1 }
0x1b2e   :  { %v3216_v55 = vsel %vm278_vm2, %v3213_v50, -inf }
0x1b2f   :  { %3217 = vmax.xlane.f32.xlu0 %v3216_v55 }
0x1b45   :  { %3227 = vrot.lane.b32.xlu0 %v5970_v35, %s5458_s22  ;;  %v6075_v35 = vadd.f32 %v5967_v14, %v5965_v0 }
0x1b49   :  { %3542 = vrot.lane.b32.xlu0 %v6067_v56, %s5453_s25 }
0x1bbc   :  { %v3218_v57 = vpop.xlane.xlu0 %3217 }
0x1bbd   :  { %v3219_v17 = vsub.f32 %v3213_v50, %v3218_v57 }
0x1bbf   :  { %v3220_v58 = vmul.f32 1.442695, %v3219_v17 }
0x1bc0   :  { %v3228_v1 = vpop.permute.xlu0 %3227 }
0x1bc1   :  { %5228 = vpow2.f32 %v3220_v58  ;;  %4996 = vmatpush3.msra.mxu0 %v3228_v1 }
0x1bc2   :  { %5005 = vmatprep.subr.mxu0 %v5449_v41 }
0x1bc4   :  { %v3543_v14 = vpop.permute.xlu0 %3542 }
0x1bcb   :  { %v5229_v43 = vpop.eup %5228 }
0x1bcc   :  { %v3222_v59 = vsel %vm278_vm2, %v5229_v43, 0.0 }
0x1bcd   :  { %3223 = vadd.xlane.f32.xlu1 %v3222_v59 }
0x1bde   :  { %3544 = vrot.lane.b32.xlu1 %v6075_v35, %s5453_s25 }
0x1bfb   :  { %v3133_v29 = vpop.f32.mrb[36].mxu0 }
0x1bfc   :  { %v3137_v36 = vadd.f32 %v3133_v29, %v2896_v11  ;;  %v4989_v60 = vpop.f32.mrb[37].mxu0 }
0x1c5a   :  { %v3224_v61 = vpop.xlane.xlu1 %3223 }
0x1c5b   :  { %5230 = vrcp.f32 %v3224_v61 }
0x1c5e   :  { %v3545_v0 = vpop.permute.xlu1 %3544 }
0x1c65   :  { %v5231_v62 = vpop.eup %5230 }
0x1c66   :  { %v3226_v51 = vmul.f32 %v5231_v62, %v5229_v43 }
0x1c68   :  { %4998 = vmatmul.mubr.msk.f32.vlgmr.msra.gmra.mrb[38].mxu0 %vm278_vm2, %v3226_v51 }
0x1c69   :  { %5006 = vmatpush3.xpose.msk.msra.mxu0 %vm278_vm2, %v6075_v35  ;;  %5007 = vmatprep.mubr.msk.f32.mxu0 %vm5450_vm1, %v5449_v41 }
0x1c6a   :  { %5015 = vmatprep.subr.mxu0 %v5449_v41 }
0x1c6c   :  { %5008 = vmatmul.mubr.msk.f32.vlgmr.msra.gmra.mrb[40].mxu0 %vm278_vm2, %v6067_v56 }
0x1c6d   :  { %5016 = vmatpush3.xpose.msk.msra.mxu0 %vm278_vm2, %v3545_v0  ;;  %5017 = vmatprep.mubr.msk.f32.mxu0 %vm5450_vm1, %v5449_v41 }
0x1c6e   :  { %5025 = vmatprep.subr.mxu0 %v5449_v41 }
0x1c70   :  { %5018 = vmatmul.mubr.msk.f32.vlgmr.msra.gmra.mrb[42].mxu0 %vm278_vm2, %v3543_v14 }
0x1c71   :  { %5026 = vmatpush3.msra.mxu0 %v6013_v4  ;;  %5027 = vmatprep.mubr.msk.f32.mxu0 %vm5450_vm1, %v5449_v41 }
0x1c72   :  { %5035 = vmatprep.subr.mxu0 %v5449_v41 }
0x1d3b   :  { %v3299_v2 = vpop.f32.mrb[38].mxu0 }
0x1d3c   :  { %v4999_v52 = vpop.f32.mrb[39].mxu0  ;;  %5003 = vmatmul.mubr.msk.f32.vlgmr.msra.gmra.mrb[36].mxu1 %vm278_vm2, %v3299_v2 }
0x1d3d   :  { %5012 = vmatprep.mubr.msk.f32.mxu1 %vm5450_vm1, %v5449_v41 }
0x1d3f   :  { %v3451_v4 = vpop.f32.mrb[40].mxu0 }
0x1d40   :  { %v3452_v5 = vadd.f32 %v3451_v4, %v6101_v3  ;;  %v5009_v6 = vpop.f32.mrb[41].mxu0 }
0x1d42   :  { %v3455_v7 = vsel %vm278_vm2, %v3452_v5, -inf }
0x1d43   :  { %3456 = vmax.xlane.f32.xlu1 %v3455_v7  ;;  %v3616_v8 = vpop.f32.mrb[42].mxu0 }
0x1d44   :  { %v3617_v12 = vadd.f32 %v3616_v8, %v6101_v3  ;;  %v5019_v13 = vpop.f32.mrb[43].mxu0 }
0x1d46   :  { %v3620_v9 = vsel %vm278_vm2, %v3617_v12, -inf }
0x1d47   :  { %3621 = vmax.xlane.f32.xlu0 %v3620_v9 }
0x1d54   :  { %3466 = vrot.lane.b32.xlu1 %v6075_v35, %s5452_s20 }
0x1d58   :  { %3855 = vrot.lane.b32.xlu1 %v6075_v35, %s5456_s26 }
0x1d5c   :  { %3853 = vrot.lane.b32.xlu1 %v6067_v56, %s5456_s26 }
0x1dd0   :  { %v3457_v15 = vpop.xlane.xlu1 %3456 }
0x1dd1   :  { %v3458_v16 = vsub.f32 %v3452_v5, %v3457_v15  ;;  %v6170_v15 = vld [vmem:[#allocation13] sm:$0x3f] }
0x1dd3   :  { %v3459_v18 = vmul.f32 1.442695, %v3458_v16 }
0x1dd4   :  { %v3467_v19 = vpop.permute.xlu1 %3466  ;;  %v3622_v20 = vpop.xlane.xlu0 %3621 }
0x1dd5   :  { %5232 = vpow2.f32 %v3459_v18  ;;  %v3623_v21 = vsub.f32 %v3617_v12, %v3622_v20  ;;  %5011 = vmatpush3.msra.mxu1 %v3467_v19 }
0x1dd6   :  { %5020 = vmatprep.subr.mxu1 %v5449_v41 }
0x1dd7   :  { %v3624_v11 = vmul.f32 1.442695, %v3623_v21 }
0x1dd8   :  { %v3856_v48 = vpop.permute.xlu1 %3855 }
0x1dd9   :  { %5234 = vpow2.f32 %v3624_v11 }
0x1ddf   :  { %v5233_v22 = vpop.eup %5232 }
0x1de0   :  { %v3461_v24 = vsel %vm278_vm2, %v5233_v22, 0.0 }
0x1de1   :  { %3462 = vadd.xlane.f32.xlu0 %v3461_v24 }
0x1de3   :  { %v5235_v25 = vpop.eup %5234 }
0x1de4   :  { %v3626_v27 = vsel %vm278_vm2, %v5235_v25, 0.0 }
0x1de5   :  { %3627 = vadd.xlane.f32.xlu0 %v3626_v27 }
0x1dfb   :  { %3631 = vrot.lane.b32.xlu0 %v6075_v35, %s5451_s2 }
0x1e0f   :  { %v3372_v28 = vpop.f32.mrb[36].mxu1 }
0x1e10   :  { %v6120_v30 = vadd.f32 %v3372_v28, %v3137_v36  ;;  %v5004_v42 = vpop.f32.mrb[37].mxu1 }
0x1e6e   :  { %v3463_v31 = vpop.xlane.xlu0 %3462 }
0x1e6f   :  { %5236 = vrcp.f32 %v3463_v31 }
0x1e72   :  { %v3628_v32 = vpop.xlane.xlu0 %3627 }
0x1e73   :  { %5238 = vrcp.f32 %v3628_v32 }
0x1e76   :  { %v3632_v37 = vpop.permute.xlu0 %3631 }
0x1e79   :  { %v5237_v33 = vpop.eup %5236 }
0x1e7a   :  { %v3465_v34 = vmul.f32 %v5237_v33, %v5233_v22 }
0x1e7c   :  { %5013 = vmatmul.mubr.msk.f32.vlgmr.msra.gmra.mrb[38].mxu1 %vm278_vm2, %v3465_v34 }
0x1e7d   :  { %v5239_v39 = vpop.eup %5238  ;;  %5021 = vmatpush3.msra.mxu1 %v3632_v37  ;;  %5022 = vmatprep.mubr.msk.f32.mxu1 %vm5450_vm1, %v5449_v41 }
0x1e7e   :  { %v3630_v40 = vmul.f32 %v5239_v39, %v5235_v25  ;;  %5030 = vmatprep.subr.mxu1 %v5449_v41 }
0x1e80   :  { %5023 = vmatmul.mubr.msk.f32.vlgmr.msra.gmra.mrb[40].mxu1 %vm278_vm2, %v3630_v40 }
0x1e81   :  { %5031 = vmatpush3.msra.mxu1 %v6018_v10  ;;  %5032 = vmatprep.mubr.msk.f32.mxu1 %vm5450_vm1, %v5449_v41  ;;  %v3854_v10 = vpop.permute.xlu1 %3853 }
0x1e82   :  { %5040 = vmatprep.subr.mxu1 %v5449_v41 }
0x1f4f   :  { %v3538_v38 = vpop.f32.mrb[38].mxu1 }
0x1f50   :  { %v5014_v44 = vpop.f32.mrb[39].mxu1  ;;  %5033 = vmatmul.mubr.msk.f32.vlgmr.msra.gmra.mrb[42].mxu1 %vm278_vm2, %v3538_v38 }
0x1f51   :  { %5042 = vmatprep.mubr.msk.f32.mxu1 %vm5450_vm1, %v5449_v41 }
0x1f53   :  { %v3703_v45 = vpop.f32.mrb[40].mxu1 }
0x1f54   :  { %v5024_v49 = vpop.f32.mrb[41].mxu1  ;;  %5028 = vmatmul.mubr.msk.f32.vlgmr.msra.gmra.mrb[44].mxu0 %vm278_vm2, %v3703_v45 }
0x1f55   :  { %5036 = vmatpush3.xpose.msk.msra.mxu0 %vm278_vm2, %v3856_v48  ;;  %5037 = vmatprep.mubr.msk.f32.mxu0 %vm5450_vm1, %v5449_v41 }
0x1f56   :  { %5045 = vmatprep.subr.mxu0 %v5449_v41 }
0x1f58   :  { %5038 = vmatmul.mubr.msk.f32.vlgmr.msra.gmra.mrb[46].mxu0 %vm278_vm2, %v3854_v10 }
0x1f59   :  { %5046 = vmatpush3.msra.mxu0 %v6054_v46  ;;  %5047 = vmatprep.mubr.msk.f32.mxu0 %vm5450_vm1, %v5449_v41 }
0x1f5a   :  { %5055 = vmatprep.subr.mxu0 %v5449_v41 }
0x2023   :  { %v3849_v50 = vpop.f32.mrb[42].mxu1 }
0x2024   :  { %v5034_v54 = vpop.f32.mrb[43].mxu1 }
0x2027   :  { %v3776_v55 = vpop.f32.mrb[44].mxu0 }
0x2028   :  { %v3850_v57 = vadd.f32 %v3849_v50, %v3776_v55  ;;  %v5029_v17 = vpop.f32.mrb[45].mxu0  ;;  %v4373_v55 = vsub.s32 5, %v5675_v26 }
0x202b   :  { %v3927_v58 = vpop.f32.mrb[46].mxu0 }
0x202c   :  { %v3928_v1 = vadd.f32 %v3927_v58, %v6101_v3  ;;  %v5039_v43 = vpop.f32.mrb[47].mxu0 }
0x202e   :  { %v3931_v59 = vsel %vm278_vm2, %v3928_v1, -inf }
0x202f   :  { %3932 = vmax.xlane.f32.xlu1 %v3931_v59 }
0x2040   :  { %4094 = vrot.lane.b32.xlu1 %v6075_v35, %s5459_s7 }
0x2044   :  { %4092 = vrot.lane.b32.xlu1 %v6067_v56, %s5459_s7 }
0x20bc   :  { %v3933_v46 = vpop.xlane.xlu1 %3932 }
0x20bd   :  { %v3934_v29 = vsub.f32 %v3928_v1, %v3933_v46 }
0x20bf   :  { %v3935_v36 = vmul.f32 1.442695, %v3934_v29  ;;  %v4377_v29 = vld [vmem:[#allocation11] sm:$0xff] }
0x20c0   :  { %v4095_v14 = vpop.permute.xlu1 %4094 }
0x20c1   :  { %5240 = vpow2.f32 %v3935_v36  ;;  %v4378_v36 = vld [vmem:[#allocation11 + $0x8] sm:$0xff] }
0x20c4   :  { %v4093_v2 = vpop.permute.xlu1 %4092 }
0x20cb   :  { %v5241_v60 = vpop.eup %5240 }
0x20cc   :  { %v3937_v61 = vsel %vm278_vm2, %v5241_v60, 0.0 }
0x20cd   :  { %3938 = vadd.xlane.f32.xlu0 %v3937_v61  ;;  %v4379_v61 = vld [vmem:[#allocation11 + $0x10] sm:$0xff] }
0x20e3   :  { %3942 = vrot.lane.b32.xlu0 %v6075_v35, %s5455_s24 }
0x215a   :  { %v3939_v62 = vpop.xlane.xlu0 %3938 }
0x215b   :  { %5242 = vrcp.f32 %v3939_v62  ;;  %v4380_v62 = vld [vmem:[#allocation11 + $0x18] sm:$0xff] }
0x215e   :  { %v3943_v51 = vpop.permute.xlu0 %3942 }
0x215f   :  { %5041 = vmatpush3.msra.mxu1 %v3943_v51  ;;  %v4468_v51 = vld [vmem:[%s6254_s9] sm:$0xff] }
0x2160   :  { %5050 = vmatprep.subr.mxu1 %v5449_v41 }
0x2165   :  { %v5243_v0 = vpop.eup %5242 }
0x2166   :  { %v3941_v56 = vmul.f32 %v5243_v0, %v5241_v60  ;;  %v5119_v60 = vpack.c.bf16 %v4378_v36, %v4377_v29  ;;  %v4469_v0 = vld [vmem:[%s6254_s9 + $0x8] sm:$0xff] }
0x2168   :  { %5043 = vmatmul.mubr.msk.f32.vlgmr.msra.gmra.mrb[44].mxu1 %vm278_vm2, %v3941_v56  ;;  %v5127_v56 = vpack.c.bf16 %v4469_v0, %v4468_v51 }
0x2169   :  { %5051 = vmatpush3.xpose.msk.msra.mxu1 %vm278_vm2, %v4095_v14  ;;  %5052 = vmatprep.mubr.msk.f32.mxu1 %vm5450_vm1, %v5449_v41  ;;  %v4470_v14 = vld [vmem:[%s6254_s9 + $0x10] sm:$0xff] }
0x216a   :  { %5060 = vmatprep.subr.mxu1 %v5449_v41 }
0x216c   :  { %5053 = vmatmul.mubr.msk.f32.vlgmr.msra.gmra.mrb[46].mxu1 %vm278_vm2, %v4093_v2  ;;  %v4471_v2 = vld [vmem:[%s6254_s9 + $0x18] sm:$0xff] }
0x216d   :  { %5061 = vmatpush3.msra.mxu1 %v6096_v63  ;;  %5062 = vmatprep.mubr.msk.f32.mxu1 %vm5450_vm1, %v5449_v41 }
0x216e   :  { %5128 = vmatprep.subr.bf16.mxu1 %v5127_v56 }
0x223b   :  { %v4014_v52 = vpop.f32.mrb[44].mxu1 }
0x223c   :  { %v5044_v4 = vpop.f32.mrb[45].mxu1  ;;  %5048 = vmatmul.mubr.msk.f32.vlgmr.msra.gmra.mrb[48].mxu0 %vm278_vm2, %v4014_v52  ;;  %v5131_v52 = vpack.c.bf16 %v4471_v2, %v4470_v14 }
0x223d   :  { %5057 = vmatprep.mubr.msk.f32.mxu0 %vm5450_vm1, %v5449_v41  ;;  %v4334_v41 = vrot.slane %v6170_v15, %v2226_v47  ;;  %v4472_v4 = vld [vmem:[%s6254_s9 + $0x20] sm:$0xff] }
0x223f   :  { %v4166_v5 = vpop.f32.mrb[46].mxu1 }
0x2240   :  { %v4167_v6 = vadd.f32 %v4166_v5, %v6101_v3  ;;  %v5054_v7 = vpop.f32.mrb[47].mxu1  ;;  %v4335_v3 = vadd.f32 %v4334_v41, %v6120_v30  ;;  %v4473_v5 = vld [vmem:[%s6254_s9 + $0x28] sm:$0xff] }
0x2242   :  { %v4170_v8 = vsel %vm278_vm2, %v4167_v6, -inf  ;;  %v6177_v18 = vadd.f32 %v4335_v3, %v5908_v23  ;;  %v4474_v3 = vld [vmem:[%s6254_s9 + $0x30] sm:$0xff] }
0x2243   :  { %4171 = vmax.xlane.f32.xlu0 %v4170_v8 }
0x2244   :  { %v4339_v19 = vsel %vm141_vm0, %v6177_v18, 0.0 }
0x2259   :  { %4181 = vrot.lane.b32.xlu0 %v6075_v35, %s5458_s22 }
0x22d0   :  { %v4172_v63 = vpop.xlane.xlu0 %4171 }
0x22d1   :  { %v4173_v12 = vsub.f32 %v4167_v6, %v4172_v63  ;;  %v5135_v6 = vpack.c.bf16 %v4473_v5, %v4472_v4 }
0x22d3   :  { %v4174_v13 = vmul.f32 1.442695, %v4173_v12 }
0x22d4   :  { %v4182_v9 = vpop.permute.xlu0 %4181 }
0x22d5   :  { %5244 = vpow2.f32 %v4174_v13  ;;  %5056 = vmatpush3.msra.mxu0 %v4182_v9 }
0x22d6   :  { %5120 = vmatprep.subr.bf16.mxu0 %v5119_v60 }
0x22df   :  { %v5245_v16 = vpop.eup %5244 }
0x22e0   :  { %v4176_v35 = vsel %vm278_vm2, %v5245_v16, 0.0 }
0x22e1   :  { %4177 = vadd.xlane.f32.xlu1 %v4176_v35 }
0x22e5   :  { %4340 = vadd.xlane.f32.xlu1 %v4339_v19 }
0x230f   :  { %v4087_v20 = vpop.f32.mrb[48].mxu0 }
0x2310   :  { %v4091_v21 = vadd.f32 %v4087_v20, %v3850_v57  ;;  %v5049_v11 = vpop.f32.mrb[49].mxu0  ;;  %v5253_v57 = vld [vmem:[%s6256_s11] sm:$0x3f] }
0x2311   :  { %v4374_v43 = vrot.slane %v5253_v57, %v4373_v55 }
0x236e   :  { %v4178_v22 = vpop.xlane.xlu1 %4177 }
0x236f   :  { %5246 = vrcp.f32 %v4178_v22 }
0x2372   :  { %v4341_v23 = vpop.xlane.xlu1 %4340 }
0x2373   :  { %v4345_v28 = vmul.f32 0.03125, %v4341_v23 }
0x2375   :  { %v4347_v32 = vsub.f32 %v6177_v18, %v4345_v28 }
0x2377   :  { %v4349_v39 = vmul.f32 %v4347_v32, %v4347_v32 }
0x2379   :  { %v5247_v24 = vpop.eup %5246  ;;  %v4351_v40 = vsel %vm141_vm0, %v4349_v39, 0.0 }
0x237a   :  { %v4180_v47 = vmul.f32 %v5247_v24, %v5245_v16  ;;  %v4475_v16 = vld [vmem:[%s6254_s9 + $0x38] sm:$0xff]  ;;  %s5462_s9 = smov [#allocation14]  }
0x237b   :  { %v5139_v35 = vpack.c.bf16 %v4475_v16, %v4474_v3  ;;  %s4573_s18 = sshll.u32 %s5462_s9, 4  ;;  %s4574_s18 = int_to_ptr.vmem [resolvable:$true] %s4573_s18 }
0x237c   :  { %5058 = vmatmul.mubr.msk.f32.vlgmr.msra.gmra.mrb[50].mxu0 %vm278_vm2, %v4180_v47  ;;  %s5408_s5 = scalar_lea.vmem %s4574_s18, 256  ;;  %p5413_p1 = scmp.lt.s32.totalorder %s4574_s18, %s4574_s18 }
0x237d   :  { %5122 = vmatpush3.bf16.msra.mxu0 %v5119_v60  ;;  %p5409_p0 = scmp.ne.s32.totalorder %s4574_s18, %s5408_s5  ;;  %p5414_p2 = scmp.lt.s32.totalorder %s5408_s5, %s5408_s5 }
0x237f   :  { %p5415_p3 = por %p5414_p2, %p5413_p1 }
0x2381   :  { %p5416_p4 = pnand %p5415_p3, %p5409_p0 }
0x244f   :  { %v4253_v25 = vpop.f32.mrb[50].mxu0 }
0x2450   :  { %v5059_v27 = vpop.f32.mrb[51].mxu0  ;;  %5063 = vmatmul.mubr.msk.f32.vlgmr.msra.gmra.mrb[48].mxu1 %vm278_vm2, %v4253_v25  ;;  %v4563_v25 = vrot.slane %v6170_v15, %v4373_v55 }
0x2451   :  { %5130 = vmatpush3.bf16.msra.mxu1 %v5127_v56 }
0x2452   :  { %5132 = vmatprep.subr.bf16.mxu1 %v5131_v52 }
0x2455   :  { %5134 = vmatpush3.bf16.msra.mxu1 %v5131_v52 }
0x2456   :  { %5136 = vmatprep.subr.bf16.mxu1 %v5135_v6 }
0x2459   :  { %5138 = vmatpush3.bf16.msra.mxu1 %v5135_v6 }
0x245a   :  { %5140 = vmatprep.subr.bf16.mxu1 %v5139_v35 }
0x245d   :  { %5142 = vmatpush3.bf16.msra.mxu1 %v5139_v35 }
0x2523   :  { %v4326_v30 = vpop.f32.mrb[48].mxu1 }
0x2524   :  { %v4330_v42 = vadd.f32 %v4326_v30, %v4091_v21  ;;  %v5064_v31 = vpop.f32.mrb[49].mxu1 }
0x2526   :  { %v4336_v33 = vadd.f32 %v4334_v41, %v4330_v42 }
0x2528   :  { %v6186_v34 = vadd.f32 %v4336_v33, %v5920_v53  ;;  %v4367_v53 = vsub.s32 4, %v5675_v26  ;;  %v5123_v26 = vpack.c.bf16 %v4380_v62, %v4379_v61 }
0x252a   :  { %v4342_v37 = vsel %vm141_vm0, %v6186_v34, 0.0  ;;  %v4368_v17 = vrot.slane %v5253_v57, %v4367_v53  ;;  %5124 = vmatprep.subr.bf16.mxu0 %v5123_v26  ;;  %v4384_v19 = vrot.slane %v6170_v15, %v4367_v53 }
0x252b   :  { %4343 = vadd.xlane.f32.xlu1 %v4342_v37  ;;  %5126 = vmatpush3.bf16.msra.mxu0 %v5123_v26 }
0x252f   :  { %4352 = vadd.xlane.f32.xlu1 %v4351_v40 }
0x25b8   :  { %v4344_v38 = vpop.xlane.xlu1 %4343 }
0x25b9   :  { %v4346_v44 = vmul.f32 0.03125, %v4344_v38 }
0x25bb   :  { %v4348_v48 = vsub.f32 %v6186_v34, %v4346_v44 }
0x25bc   :  { %v4353_v45 = vpop.xlane.xlu1 %4352 }
0x25bd   :  { %v4357_v49 = vmul.f32 0.03125, %v4353_v45  ;;  %v4350_v10 = vmul.f32 %v4348_v48, %v4348_v48 }
0x25bf   :  { %v4359_v50 = vadd.f32 1e-05, %v4357_v49  ;;  %v4354_v54 = vsel %vm141_vm0, %v4350_v10, 0.0 }
0x25c0   :  { %4355 = vadd.xlane.f32.xlu1 %v4354_v54 }
0x25c1   :  { %5248 = vrsqrt.f32 %v4359_v50 }
0x25cb   :  { %v5249_v58 = vpop.eup %5248 }
0x25cc   :  { %v4363_v1 = vmul.f32 %v5249_v58, %v4347_v32 }
0x25ce   :  { %v4369_v59 = vmul.f32 %v4368_v17, %v4363_v1 }
0x25d0   :  { %v4375_v46 = vadd.f32 %v4374_v43, %v4369_v59 }
0x25d2   :  { %5073 = vmatprep.mubr.msk.f32.mxu0 %vm141_vm0, %v4375_v46 }
0x264d   :  { %v4356_v7 = vpop.xlane.xlu1 %4355 }
0x264e   :  { %v4358_v8 = vmul.f32 0.03125, %v4356_v7 }
0x2650   :  { %v4360_v63 = vadd.f32 1e-05, %v4358_v8 }
0x2652   :  { %5250 = vrsqrt.f32 %v4360_v63 }
0x265c   :  { %v5251_v12 = vpop.eup %5250 }
0x265d   :  { %v4364_v13 = vmul.f32 %v5251_v12, %v4348_v48 }
0x265f   :  { %v4370_v9 = vmul.f32 %v4368_v17, %v4364_v13 }
0x2661   :  { %v4376_v41 = vadd.f32 %v4374_v43, %v4370_v9 }
0x2663   :  { %5074 = vmatmul.mubr.msk.f32.vlgmr.msra.gmra.mrb[52].mxu0 %vm141_vm0, %v4376_v41 }
0x2736   :  { %v5075_v20 = vpop.f32.mrb[52].mxu0 }
0x2737   :  { %v4463_v21 = vadd.f32 %v5075_v20, %v4384_v19  ;;  %v4457_v11 = vpop.f32.mrb[53].mxu0 }
0x2738   :  { %v4458_v22 = vadd.f32 %v4457_v11, %v4384_v19 }
0x2739   :  { %v4467_v47 = vmax.f32 %v4463_v21, 0.0 }
0x273a   :  { %v4466_v24 = vmax.f32 %v4458_v22, 0.0 }
0x273c   :  { %5092 = vmatprep.mubr.msk.f32.mxu1 %vm4476_vm3, %v4466_v24 }
0x273d   :  { %5093 = vmatmul.mubr.msk.f32.vlgmr.msra.gmra.mrb[50].mxu1 %vm4476_vm3, %v4467_v47 }
0x2810   :  { %v5094_v27 = vpop.f32.mrb[50].mxu1 }
0x2811   :  { %v4559_v23 = vadd.f32 %v5094_v27, %v6186_v34  ;;  %v4549_v28 = vpop.f32.mrb[51].mxu1 }
0x2812   :  { %v4558_v30 = vadd.f32 %v4549_v28, %v6177_v18 }
0x2813   :  { %v4565_v42 = vadd.f32 %v4563_v25, %v4559_v23 }
0x2814   :  { %v4564_v31 = vadd.f32 %v4563_v25, %v4558_v30 }
0x2815   :  { %4567 = vst.msk [vmem:[#allocation14 + $0x8] sm:$0xff] %vm141_vm0, %v4565_v42 }
0x2816   :  { %4566 = vst.msk [vmem:[#allocation14] sm:$0xff] %vm141_vm0, %v4564_v31 }
0x2817   :  { %5419 = shalt.err (!%p5416_p4)
}
0x2818   :  { %s5420_s19 = scalar_lea.hbm %s6257_s12, 256 }
0x2819   :  { %p5421_p5 = scmp.ne.s32.totalorder %s6257_s12, %s5420_s19  ;;  %p5424_p6 = scmp.lt.u32.totalorder %s5420_s19, %s6257_s12 }
0x281b   :  { %p5426_p7 = pnand %p5424_p6, %p5421_p5 }
0x281d   :  { %5429 = shalt.err (!%p5426_p7)
}
0x281e   :  { %4579 = dma.vmem_to_hbm [thread:$0]  %s4574_s18, 256, %s6257_s12, [#allocation4], %s5442_s15, %s5442_s15, %s5443_s16  }
0x281f   :  { %5438 = dma.done.wait [#allocation4], 256  }
0x2820   :  { %5439 = vsyncadd [#allocation4], 4294967040 }
0x2821   :  { %4583 = vsyncpa [#allocation3], 1 }
0x2822   :  { %4584 = vsyncpa [#allocation6], 1 }
0x2823   :  { %4585 = vsyncpa [#allocation9], 1 }
0x2824   :  { %4586 = vsyncpa [#allocation12], 1 }
0x2825   :  { %4587 = vsyncpa [#allocation4], 1 }

</bundles_post_ra>
